<compile_context>
chip_gen: v6e
topology: v6e:2x2x1
jax: 0.10.0
libtpu: 0.0.40
codegen_flags: <defaults>
</compile_context>

<pallas_src>
import functools

import jax
import jax.numpy as jnp
import numpy as np
from jax.experimental import pallas as pl
from jax.experimental.pallas import tpu as pltpu


# ----------------------------- fused per-layer Pallas kernel -----------------------------

def _layer_kernel(x_ref, wc_ref, gamma_ref, beta_ref, o_ref, xpad_ref, *,
                  n_batch, H, W, Cin, Cout, Ho, Wo, stride, apply_relu, eps):
    """One _Block rep, fully fused; one batch element per grid step.

    x_ref    : (1, H, W, Cin)        streamed input block for batch element i
    wc_ref   : (9, Cin, Cout)        combined weights  wc[k] = dw[k][:, None] * pw
    gamma_ref: (1, Cout)
    beta_ref : (1, Cout)
    o_ref    : (n_batch, Ho*Wo, Cout) resident output block (constant index_map)
    xpad_ref : (H+2, W+2, Cin)       zero-padded halo scratch (persists across grid steps)
    """
    i = pl.program_id(0)

    # Zero the halo border once; the interior is fully overwritten every step.
    @pl.when(i == 0)
    def _():
        xpad_ref[...] = jnp.zeros_like(xpad_ref)

    # ---- fused ReLU + in-kernel halo (relu(0) == 0, so ReLU commutes with zero padding) --
    x = x_ref[0].astype(jnp.float32)                       # (H, W, Cin)
    if apply_relu:
        x = jnp.maximum(x, 0.0)
    xpad_ref[1:H + 1, 1:W + 1, :] = x

    # ---- depthwise 3x3 folded into the pointwise: 9 accumulated MXU matmuls --------------
    # Taps are read at the output stride, so only retained positions are computed.
    wc = wc_ref[...]                                       # (9, Cin, Cout)
    acc = jnp.zeros((Ho * Wo, Cout), jnp.float32)
    for ky in range(3):
        for kx in range(3):
            if stride == 1:
                tap = xpad_ref[ky:ky + Ho, kx:kx + Wo, :]                        # (Ho, Wo, Cin)
            else:
                tap = xpad_ref[pl.ds(ky, Ho, stride), pl.ds(kx, Wo, stride), :]  # strided read
            acc = acc + jnp.dot(tap.reshape(Ho * Wo, Cin), wc[ky * 3 + kx],
                                preferred_element_type=jnp.float32)

    # Un-normalized conv result stays resident in the output block (no HBM round trip).
    o_ref[i] = acc

    # ---- finalize BatchNorm2d (training mode) once, over the VMEM-resident conv ----------
    @pl.when(i == n_batch - 1)
    def _():
        flat = o_ref[...].reshape(n_batch * Ho * Wo, Cout)
        cnt = float(n_batch * Ho * Wo)
        mean = jnp.sum(flat, axis=0, keepdims=True) / cnt            # (1, Cout)
        diff = flat - mean
        var = jnp.sum(diff * diff, axis=0, keepdims=True) / cnt      # biased variance
        inv = jax.lax.rsqrt(var + eps)
        y = diff * inv * gamma_ref[...] + beta_ref[...]
        o_ref[...] = y.reshape(n_batch, Ho * Wo, Cout)


# ----------------------------- pallas_call wrapper (one call per rep) ---------------------

def _fused_layer(x, dw, pw, gamma, beta, *, stride, apply_relu, eps=1e-5):
    """x: (N, H, W, Cin) NHWC -> (N, Ho, Wo, Cout) NHWC, in a single fused pallas_call."""
    N, H, W, Cin = x.shape
    Cout = pw.shape[-1]
    Ho = (H + 2 - 3) // stride + 1
    Wo = (W + 2 - 3) // stride + 1

    # Fold depthwise into pointwise: wc[k, c, o] = dw[k, c] * pw[c, o]  (tiny, done once).
    wc = dw[:, :, None] * pw[None, :, :]

    kernel = functools.partial(
        _layer_kernel, n_batch=N, H=H, W=W, Cin=Cin, Cout=Cout,
        Ho=Ho, Wo=Wo, stride=stride, apply_relu=apply_relu, eps=eps)

    # NOTE: for production Xception sizes where the whole (N, Ho*Wo, Cout) output no longer
    # fits VMEM, this would become a spatially tiled conv pass accumulating per-channel
    # sum/sum-of-squares partials plus a second normalize pass; at these shapes the fully
    # fused single-residency form is strictly cheaper (one launch, zero intermediate HBM).
    out = pl.pallas_call(
        kernel,
        grid=(N,),
        out_shape=jax.ShapeDtypeStruct((N, Ho * Wo, Cout), jnp.float32),
        in_specs=[
            pl.BlockSpec((1, H, W, Cin), lambda i: (i, 0, 0, 0)),   # streamed / pipelined
            pl.BlockSpec((9, Cin, Cout), lambda i: (0, 0, 0)),      # resident weights
            pl.BlockSpec((1, Cout), lambda i: (0, 0)),
            pl.BlockSpec((1, Cout), lambda i: (0, 0)),
        ],
        # Constant block index -> the output stays VMEM-resident across the whole grid and is
        # written back to HBM exactly once, after the BN finalize on the last step.
        out_specs=pl.BlockSpec((N, Ho * Wo, Cout), lambda i: (0, 0, 0)),
        scratch_shapes=[pltpu.VMEM((H + 2, W + 2, Cin), jnp.float32)],
        compiler_params=pltpu.CompilerParams(
            # Training-mode BN statistics are a global reduction over (N,H,W): the batch axis
            # carries the accumulator/resident output, so it must be sequential.
            dimension_semantics=("arbitrary",),
        ),
    )(x, wc, gamma, beta)

    return out.reshape(N, Ho, Wo, Cout)       # row-major reshape only, no relayout


# ----------------------------- _Block construction ---------------------------------------

def make_block_params(key, in_filters, out_filters, reps, strides=1,
                      start_with_relu=True, grow_first=True):
    """Deterministic synthetic parameters mirroring _Block.__init__ layer structure."""
    layer_specs = []
    filters = in_filters
    if grow_first:
        layer_specs.append((in_filters, out_filters, strides))
        filters = out_filters
    for _ in range(reps - 1):
        layer_specs.append((filters, filters, 1))
    if not grow_first:
        layer_specs.append((in_filters, out_filters, strides))

    params = []
    for i, (cin, cout, stride) in enumerate(layer_specs):
        key, k1, k2, k3, k4 = jax.random.split(key, 5)
        dw = 0.2 * jax.random.normal(k1, (9, cin), jnp.float32)        # depthwise (3*3, Cin)
        pw = 0.2 * jax.random.normal(k2, (cin, cout), jnp.float32)     # pointwise (Cin, Cout)
        gamma = 1.0 + 0.1 * jax.random.normal(k3, (1, cout), jnp.float32)
        beta = 0.1 * jax.random.normal(k4, (1, cout), jnp.float32)
        apply_relu = bool(start_with_relu) if i == 0 else True         # rep[0] relu dropped iff not start_with_relu
        params.append(dict(dw=dw, pw=pw, gamma=gamma, beta=beta,
                           stride=stride, apply_relu=apply_relu))
    return params


def block_forward_nhwc(x_nhwc, params):
    """_Block.forward with activations kept NHWC (chain this form across blocks)."""
    x = x_nhwc
    for p in params:
        x = _fused_layer(x, p["dw"], p["pw"], p["gamma"], p["beta"],
                         stride=p["stride"], apply_relu=p["apply_relu"])
    return x


def block_forward(x_nchw, params):
    """NCHW in/out to match the PyTorch module; transposes only at the module boundary."""
    x = jnp.transpose(x_nchw, (0, 2, 3, 1))          # NCHW -> NHWC (once)
    x = block_forward_nhwc(x, params)
    return jnp.transpose(x, (0, 3, 1, 2))            # NHWC -> NCHW (once)


# ----------------------------- plain-JAX reference (for verification) ---------------------

def _ref_layer(x, p, eps=1e-5):
    if p["apply_relu"]:
        x = jnp.maximum(x, 0.0)
    N, H, W, Cin = x.shape
    xpad = jnp.pad(x, ((0, 0), (1, 1), (1, 1), (0, 0)))
    acc = jnp.zeros((N, H, W, Cin), jnp.float32)
    for ky in range(3):
        for kx in range(3):
            acc = acc + xpad[:, ky:ky + H, kx:kx + W, :] * p["dw"][ky * 3 + kx]
    out = jnp.einsum("nhwc,cd->nhwd", acc, p["pw"])
    s = p["stride"]
    if s > 1:
        out = out[:, ::s, ::s, :]
    mean = out.mean(axis=(0, 1, 2), keepdims=True)
    var = ((out - mean) ** 2).mean(axis=(0, 1, 2), keepdims=True)
    g = p["gamma"].reshape(1, 1, 1, -1)
    b = p["beta"].reshape(1, 1, 1, -1)
    return (out - mean) * jax.lax.rsqrt(var + eps) * g + b


# ----------------------------- main --------------------------------------------------------

if __name__ == "__main__":
    key = jax.random.PRNGKey(0)
    kx, kp = jax.random.split(key)

    # _Block(in_filters=4, out_filters=8, reps=2, strides=2, start_with_relu=True, grow_first=True)
    N, Cin, H, W = 2, 4, 16, 16
    Cout, reps, strides = 8, 2, 2

    x = jax.random.normal(kx, (N, Cin, H, W), jnp.float32)
    params = make_block_params(kp, Cin, Cout, reps, strides,
                               start_with_relu=True, grow_first=True)

    y = jax.block_until_ready(block_forward(x, params))   # (2, 8, 8, 8) NCHW

    # Verify against a plain-JAX reference of the same math.
    xr = jnp.transpose(x, (0, 2, 3, 1))
    for p in params:
        xr = _ref_layer(xr, p)
    ref = jnp.transpose(xr, (0, 3, 1, 2))
    np.testing.assert_allclose(np.asarray(y), np.asarray(ref), atol=2e-4, rtol=2e-4)

    print("KERNEL_OK")
</pallas_src>

<mosaic_0001>
module attributes {stable_mosaic.version = 11 : i64} {
  func.func @_layer_kernel(%arg0: i32, %arg1: memref<1x16x16x4xf32, #tpu.memory_space<vmem>>, %arg2: memref<9x4x8xf32, #tpu.memory_space<vmem>>, %arg3: memref<1x8xf32, #tpu.memory_space<vmem>>, %arg4: memref<1x8xf32, #tpu.memory_space<vmem>>, %arg5: memref<2x64x8xf32, #tpu.memory_space<vmem>>, %arg6: memref<18x18x4xf32, #tpu.memory_space<vmem>>) attributes {dimension_semantics = [#tpu.dimension_semantics<arbitrary>], iteration_bounds = array<i64: 2>, scalar_prefetch = 0 : i64, scratch_operands = 1 : i64, tpu.core_type = #tpu.core_type<tc>, window_params = [{transform_indices = @transform_0, window_bounds = array<i64: 1, 16, 16, 4>}, {pipeline_mode = #tpu.pipeline_mode<synchronous>, transform_indices = @transform_1, window_bounds = array<i64: 9, 4, 8>}, {pipeline_mode = #tpu.pipeline_mode<synchronous>, transform_indices = @transform_2, window_bounds = array<i64: 1, 8>}, {pipeline_mode = #tpu.pipeline_mode<synchronous>, transform_indices = @transform_3, window_bounds = array<i64: 1, 8>}, {pipeline_mode = #tpu.pipeline_mode<synchronous>, transform_indices = @transform_4, window_bounds = array<i64: 2, 64, 8>}]} {
    %c0_i32 = arith.constant 0 : i32
    %0 = arith.cmpi eq, %arg0, %c0_i32 : i32
    %1 = arith.extui %0 : i1 to i32
    %c0_i32_0 = arith.constant 0 : i32
    %2 = arith.cmpi ne, %1, %c0_i32_0 : i32
    scf.if %2 {
      %cst_48 = arith.constant 0.000000e+00 : f32
      %71 = vector.broadcast %cst_48 : f32 to vector<18x18x4xf32>
      %c0_49 = arith.constant 0 : index
      %c0_50 = arith.constant 0 : index
      %c0_51 = arith.constant 0 : index
      %72 = vector.load %arg6[%c0_49, %c0_50, %c0_51] : memref<18x18x4xf32, #tpu.memory_space<vmem>>, vector<18x18x4xf32>
      tpu.vector_store %arg6[%c0_49, %c0_50, %c0_51], %71 {strides = array<i32>} : memref<18x18x4xf32, #tpu.memory_space<vmem>>, vector<18x18x4xf32>,
    } else {
    }
    %c0 = arith.constant 0 : index
    %c0_1 = arith.constant 0 : index
    %c0_2 = arith.constant 0 : index
    %c0_3 = arith.constant 0 : index
    %3 = vector.load %arg1[%c0, %c0_1, %c0_2, %c0_3] : memref<1x16x16x4xf32, #tpu.memory_space<vmem>>, vector<1x16x16x4xf32>
    %4 = vector.shape_cast %3 : vector<1x16x16x4xf32> to vector<16x16x4xf32>
    %cst = arith.constant 0.000000e+00 : f32
    %5 = vector.broadcast %cst : f32 to vector<16x16x4xf32>
    %6 = arith.maximumf %4, %5 : vector<16x16x4xf32>
    %c1 = arith.constant 1 : index
    %c1_4 = arith.constant 1 : index
    %c0_5 = arith.constant 0 : index
    %7 = vector.load %arg6[%c1, %c1_4, %c0_5] : memref<18x18x4xf32, #tpu.memory_space<vmem>>, vector<16x16x4xf32>
    tpu.vector_store %arg6[%c1, %c1_4, %c0_5], %6 {strides = array<i32>} : memref<18x18x4xf32, #tpu.memory_space<vmem>>, vector<16x16x4xf32>,
    %c0_6 = arith.constant 0 : index
    %c0_7 = arith.constant 0 : index
    %c0_8 = arith.constant 0 : index
    %8 = vector.load %arg2[%c0_6, %c0_7, %c0_8] : memref<9x4x8xf32, #tpu.memory_space<vmem>>, vector<9x4x8xf32>
    %cst_9 = arith.constant 0.000000e+00 : f32
    %9 = vector.broadcast %cst_9 : f32 to vector<64x8xf32>
    %c0_10 = arith.constant 0 : index
    %c0_11 = arith.constant 0 : index
    %c0_12 = arith.constant 0 : index
    %10 = tpu.strided_load %arg6[%c0_10, %c0_11, %c0_12] {strides = array<i32: 2, 2, 1>} : memref<18x18x4xf32, #tpu.memory_space<vmem>>, vector<8x8x4xf32>
    %11 = vector.shape_cast %10 : vector<8x8x4xf32> to vector<64x4xf32>
    %12 = vector.extract_strided_slice %8 {offsets = [0, 0, 0], sizes = [1, 4, 8], strides = [1, 1, 1]} : vector<9x4x8xf32> to vector<1x4x8xf32>
    %13 = vector.shape_cast %12 : vector<1x4x8xf32> to vector<4x8xf32>
    %cst_13 = arith.constant dense<0.000000e+00> : vector<64x8xf32>
    %14 = tpu.matmul %11, %13, %cst_13 {dimension_numbers = #tpu.dot_dimension_numbers<[1], [0], [0], [1], [0, 0, 1, 1], [], []>} : vector<64x4xf32>, vector<4x8xf32>, vector<64x8xf32> -> vector<64x8xf32>
    %15 = arith.addf %9, %14 : vector<64x8xf32>
    %c0_14 = arith.constant 0 : index
    %c1_15 = arith.constant 1 : index
    %c0_16 = arith.constant 0 : index
    %16 = tpu.strided_load %arg6[%c0_14, %c1_15, %c0_16] {strides = array<i32: 2, 2, 1>} : memref<18x18x4xf32, #tpu.memory_space<vmem>>, vector<8x8x4xf32>
    %17 = vector.shape_cast %16 : vector<8x8x4xf32> to vector<64x4xf32>
    %18 = vector.extract_strided_slice %8 {offsets = [1, 0, 0], sizes = [1, 4, 8], strides = [1, 1, 1]} : vector<9x4x8xf32> to vector<1x4x8xf32>
    %19 = vector.shape_cast %18 : vector<1x4x8xf32> to vector<4x8xf32>
    %cst_17 = arith.constant dense<0.000000e+00> : vector<64x8xf32>
    %20 = tpu.matmul %17, %19, %cst_17 {dimension_numbers = #tpu.dot_dimension_numbers<[1], [0], [0], [1], [0, 0, 1, 1], [], []>} : vector<64x4xf32>, vector<4x8xf32>, vector<64x8xf32> -> vector<64x8xf32>
    %21 = arith.addf %15, %20 : vector<64x8xf32>
    %c0_18 = arith.constant 0 : index
    %c2 = arith.constant 2 : index
    %c0_19 = arith.constant 0 : index
    %22 = tpu.strided_load %arg6[%c0_18, %c2, %c0_19] {strides = array<i32: 2, 2, 1>} : memref<18x18x4xf32, #tpu.memory_space<vmem>>, vector<8x8x4xf32>
    %23 = vector.shape_cast %22 : vector<8x8x4xf32> to vector<64x4xf32>
    %24 = vector.extract_strided_slice %8 {offsets = [2, 0, 0], sizes = [1, 4, 8], strides = [1, 1, 1]} : vector<9x4x8xf32> to vector<1x4x8xf32>
    %25 = vector.shape_cast %24 : vector<1x4x8xf32> to vector<4x8xf32>
    %cst_20 = arith.constant dense<0.000000e+00> : vector<64x8xf32>
    %26 = tpu.matmul %23, %25, %cst_20 {dimension_numbers = #tpu.dot_dimension_numbers<[1], [0], [0], [1], [0, 0, 1, 1], [], []>} : vector<64x4xf32>, vector<4x8xf32>, vector<64x8xf32> -> vector<64x8xf32>
    %27 = arith.addf %21, %26 : vector<64x8xf32>
    %c1_21 = arith.constant 1 : index
    %c0_22 = arith.constant 0 : index
    %c0_23 = arith.constant 0 : index
    %28 = tpu.strided_load %arg6[%c1_21, %c0_22, %c0_23] {strides = array<i32: 2, 2, 1>} : memref<18x18x4xf32, #tpu.memory_space<vmem>>, vector<8x8x4xf32>
    %29 = vector.shape_cast %28 : vector<8x8x4xf32> to vector<64x4xf32>
    %30 = vector.extract_strided_slice %8 {offsets = [3, 0, 0], sizes = [1, 4, 8], strides = [1, 1, 1]} : vector<9x4x8xf32> to vector<1x4x8xf32>
    %31 = vector.shape_cast %30 : vector<1x4x8xf32> to vector<4x8xf32>
    %cst_24 = arith.constant dense<0.000000e+00> : vector<64x8xf32>
    %32 = tpu.matmul %29, %31, %cst_24 {dimension_numbers = #tpu.dot_dimension_numbers<[1], [0], [0], [1], [0, 0, 1, 1], [], []>} : vector<64x4xf32>, vector<4x8xf32>, vector<64x8xf32> -> vector<64x8xf32>
    %33 = arith.addf %27, %32 : vector<64x8xf32>
    %c1_25 = arith.constant 1 : index
    %c1_26 = arith.constant 1 : index
    %c0_27 = arith.constant 0 : index
    %34 = tpu.strided_load %arg6[%c1_25, %c1_26, %c0_27] {strides = array<i32: 2, 2, 1>} : memref<18x18x4xf32, #tpu.memory_space<vmem>>, vector<8x8x4xf32>
    %35 = vector.shape_cast %34 : vector<8x8x4xf32> to vector<64x4xf32>
    %36 = vector.extract_strided_slice %8 {offsets = [4, 0, 0], sizes = [1, 4, 8], strides = [1, 1, 1]} : vector<9x4x8xf32> to vector<1x4x8xf32>
    %37 = vector.shape_cast %36 : vector<1x4x8xf32> to vector<4x8xf32>
    %cst_28 = arith.constant dense<0.000000e+00> : vector<64x8xf32>
    %38 = tpu.matmul %35, %37, %cst_28 {dimension_numbers = #tpu.dot_dimension_numbers<[1], [0], [0], [1], [0, 0, 1, 1], [], []>} : vector<64x4xf32>, vector<4x8xf32>, vector<64x8xf32> -> vector<64x8xf32>
    %39 = arith.addf %33, %38 : vector<64x8xf32>
    %c1_29 = arith.constant 1 : index
    %c2_30 = arith.constant 2 : index
    %c0_31 = arith.constant 0 : index
    %40 = tpu.strided_load %arg6[%c1_29, %c2_30, %c0_31] {strides = array<i32: 2, 2, 1>} : memref<18x18x4xf32, #tpu.memory_space<vmem>>, vector<8x8x4xf32>
    %41 = vector.shape_cast %40 : vector<8x8x4xf32> to vector<64x4xf32>
    %42 = vector.extract_strided_slice %8 {offsets = [5, 0, 0], sizes = [1, 4, 8], strides = [1, 1, 1]} : vector<9x4x8xf32> to vector<1x4x8xf32>
    %43 = vector.shape_cast %42 : vector<1x4x8xf32> to vector<4x8xf32>
    %cst_32 = arith.constant dense<0.000000e+00> : vector<64x8xf32>
    %44 = tpu.matmul %41, %43, %cst_32 {dimension_numbers = #tpu.dot_dimension_numbers<[1], [0], [0], [1], [0, 0, 1, 1], [], []>} : vector<64x4xf32>, vector<4x8xf32>, vector<64x8xf32> -> vector<64x8xf32>
    %45 = arith.addf %39, %44 : vector<64x8xf32>
    %c2_33 = arith.constant 2 : index
    %c0_34 = arith.constant 0 : index
    %c0_35 = arith.constant 0 : index
    %46 = tpu.strided_load %arg6[%c2_33, %c0_34, %c0_35] {strides = array<i32: 2, 2, 1>} : memref<18x18x4xf32, #tpu.memory_space<vmem>>, vector<8x8x4xf32>
    %47 = vector.shape_cast %46 : vector<8x8x4xf32> to vector<64x4xf32>
    %48 = vector.extract_strided_slice %8 {offsets = [6, 0, 0], sizes = [1, 4, 8], strides = [1, 1, 1]} : vector<9x4x8xf32> to vector<1x4x8xf32>
    %49 = vector.shape_cast %48 : vector<1x4x8xf32> to vector<4x8xf32>
    %cst_36 = arith.constant dense<0.000000e+00> : vector<64x8xf32>
    %50 = tpu.matmul %47, %49, %cst_36 {dimension_numbers = #tpu.dot_dimension_numbers<[1], [0], [0], [1], [0, 0, 1, 1], [], []>} : vector<64x4xf32>, vector<4x8xf32>, vector<64x8xf32> -> vector<64x8xf32>
    %51 = arith.addf %45, %50 : vector<64x8xf32>
    %c2_37 = arith.constant 2 : index
    %c1_38 = arith.constant 1 : index
    %c0_39 = arith.constant 0 : index
    %52 = tpu.strided_load %arg6[%c2_37, %c1_38, %c0_39] {strides = array<i32: 2, 2, 1>} : memref<18x18x4xf32, #tpu.memory_space<vmem>>, vector<8x8x4xf32>
    %53 = vector.shape_cast %52 : vector<8x8x4xf32> to vector<64x4xf32>
    %54 = vector.extract_strided_slice %8 {offsets = [7, 0, 0], sizes = [1, 4, 8], strides = [1, 1, 1]} : vector<9x4x8xf32> to vector<1x4x8xf32>
    %55 = vector.shape_cast %54 : vector<1x4x8xf32> to vector<4x8xf32>
    %cst_40 = arith.constant dense<0.000000e+00> : vector<64x8xf32>
    %56 = tpu.matmul %53, %55, %cst_40 {dimension_numbers = #tpu.dot_dimension_numbers<[1], [0], [0], [1], [0, 0, 1, 1], [], []>} : vector<64x4xf32>, vector<4x8xf32>, vector<64x8xf32> -> vector<64x8xf32>
    %57 = arith.addf %51, %56 : vector<64x8xf32>
    %c2_41 = arith.constant 2 : index
    %c2_42 = arith.constant 2 : index
    %c0_43 = arith.constant 0 : index
    %58 = tpu.strided_load %arg6[%c2_41, %c2_42, %c0_43] {strides = array<i32: 2, 2, 1>} : memref<18x18x4xf32, #tpu.memory_space<vmem>>, vector<8x8x4xf32>
    %59 = vector.shape_cast %58 : vector<8x8x4xf32> to vector<64x4xf32>
    %60 = vector.extract_strided_slice %8 {offsets = [8, 0, 0], sizes = [1, 4, 8], strides = [1, 1, 1]} : vector<9x4x8xf32> to vector<1x4x8xf32>
    %61 = vector.shape_cast %60 : vector<1x4x8xf32> to vector<4x8xf32>
    %cst_44 = arith.constant dense<0.000000e+00> : vector<64x8xf32>
    %62 = tpu.matmul %59, %61, %cst_44 {dimension_numbers = #tpu.dot_dimension_numbers<[1], [0], [0], [1], [0, 0, 1, 1], [], []>} : vector<64x4xf32>, vector<4x8xf32>, vector<64x8xf32> -> vector<64x8xf32>
    %63 = arith.addf %57, %62 : vector<64x8xf32>
    %64 = arith.index_cast %arg0 : i32 to index
    %c0_45 = arith.constant 0 : index
    %c0_46 = arith.constant 0 : index
    %65 = vector.load %arg5[%64, %c0_45, %c0_46] : memref<2x64x8xf32, #tpu.memory_space<vmem>>, vector<1x64x8xf32>
    %66 = vector.shape_cast %65 : vector<1x64x8xf32> to vector<64x8xf32>
    %67 = vector.shape_cast %63 : vector<64x8xf32> to vector<1x64x8xf32>
    tpu.vector_store %arg5[%64, %c0_45, %c0_46], %67 {strides = array<i32>} : memref<2x64x8xf32, #tpu.memory_space<vmem>>, vector<1x64x8xf32>,
    %c1_i32 = arith.constant 1 : i32
    %68 = arith.cmpi eq, %arg0, %c1_i32 : i32
    %69 = arith.extui %68 : i1 to i32
    %c0_i32_47 = arith.constant 0 : i32
    %70 = arith.cmpi ne, %69, %c0_i32_47 : i32
    scf.if %70 {
      %c0_48 = arith.constant 0 : index
      %c0_49 = arith.constant 0 : index
      %c0_50 = arith.constant 0 : index
      %71 = vector.load %arg5[%c0_48, %c0_49, %c0_50] : memref<2x64x8xf32, #tpu.memory_space<vmem>>, vector<2x64x8xf32>
      %72 = vector.shape_cast %71 : vector<2x64x8xf32> to vector<128x8xf32>
      %cst_51 = arith.constant dense<0.000000e+00> : vector<8xf32>
      %73 = vector.multi_reduction <add>, %72, %cst_51 [0] : vector<128x8xf32> to vector<8xf32>
      %74 = vector.shape_cast %73 : vector<8xf32> to vector<1x8xf32>
      %cst_52 = arith.constant 1.280000e+02 : f32
      %75 = vector.broadcast %cst_52 : f32 to vector<1x8xf32>
      %76 = arith.divf %74, %75 : vector<1x8xf32>
      %77 = vector.broadcast %76 : vector<1x8xf32> to vector<128x8xf32>
      %78 = arith.subf %72, %77 : vector<128x8xf32>
      %79 = arith.mulf %78, %78 : vector<128x8xf32>
      %cst_53 = arith.constant dense<0.000000e+00> : vector<8xf32>
      %80 = vector.multi_reduction <add>, %79, %cst_53 [0] : vector<128x8xf32> to vector<8xf32>
      %81 = vector.shape_cast %80 : vector<8xf32> to vector<1x8xf32>
      %cst_54 = arith.constant 1.280000e+02 : f32
      %82 = vector.broadcast %cst_54 : f32 to vector<1x8xf32>
      %83 = arith.divf %81, %82 : vector<1x8xf32>
      %cst_55 = arith.constant 9.99999974E-6 : f32
      %84 = vector.broadcast %cst_55 : f32 to vector<1x8xf32>
      %85 = arith.addf %83, %84 : vector<1x8xf32>
      %86 = math.rsqrt %85 : vector<1x8xf32>
      %87 = vector.broadcast %86 : vector<1x8xf32> to vector<128x8xf32>
      %88 = arith.mulf %78, %87 : vector<128x8xf32>
      %c0_56 = arith.constant 0 : index
      %c0_57 = arith.constant 0 : index
      %89 = vector.load %arg3[%c0_56, %c0_57] : memref<1x8xf32, #tpu.memory_space<vmem>>, vector<1x8xf32>
      %90 = vector.broadcast %89 : vector<1x8xf32> to vector<128x8xf32>
      %91 = arith.mulf %88, %90 : vector<128x8xf32>
      %c0_58 = arith.constant 0 : index
      %c0_59 = arith.constant 0 : index
      %92 = vector.load %arg4[%c0_58, %c0_59] : memref<1x8xf32, #tpu.memory_space<vmem>>, vector<1x8xf32>
      %93 = vector.broadcast %92 : vector<1x8xf32> to vector<128x8xf32>
      %94 = arith.addf %91, %93 : vector<128x8xf32>
      %95 = vector.shape_cast %94 : vector<128x8xf32> to vector<2x64x8xf32>
      %c0_60 = arith.constant 0 : index
      %c0_61 = arith.constant 0 : index
      %c0_62 = arith.constant 0 : index
      %96 = vector.load %arg5[%c0_60, %c0_61, %c0_62] : memref<2x64x8xf32, #tpu.memory_space<vmem>>, vector<2x64x8xf32>
      tpu.vector_store %arg5[%c0_60, %c0_61, %c0_62], %95 {strides = array<i32>} : memref<2x64x8xf32, #tpu.memory_space<vmem>>, vector<2x64x8xf32>,
    } else {
    }
    return
  }
  func.func @transform_0(%arg0: i32) -> (i32, i32, i32, i32) {
    %c0_i32 = arith.constant 0 : i32
    %c0_i32_0 = arith.constant 0 : i32
    %c0_i32_1 = arith.constant 0 : i32
    %c0_i32_2 = arith.constant 0 : i32
    return %arg0, %c0_i32, %c0_i32_0, %c0_i32_1 : i32, i32, i32, i32
  }
  func.func @transform_1(%arg0: i32) -> (i32, i32, i32) {
    %c0_i32 = arith.constant 0 : i32
    %c0_i32_0 = arith.constant 0 : i32
    %c0_i32_1 = arith.constant 0 : i32
    %c0_i32_2 = arith.constant 0 : i32
    return %c0_i32, %c0_i32_0, %c0_i32_1 : i32, i32, i32
  }
  func.func @transform_2(%arg0: i32) -> (i32, i32) {
    %c0_i32 = arith.constant 0 : i32
    %c0_i32_0 = arith.constant 0 : i32
    %c0_i32_1 = arith.constant 0 : i32
    return %c0_i32, %c0_i32_0 : i32, i32
  }
  func.func @transform_3(%arg0: i32) -> (i32, i32) {
    %c0_i32 = arith.constant 0 : i32
    %c0_i32_0 = arith.constant 0 : i32
    %c0_i32_1 = arith.constant 0 : i32
    return %c0_i32, %c0_i32_0 : i32, i32
  }
  func.func @transform_4(%arg0: i32) -> (i32, i32, i32) {
    %c0_i32 = arith.constant 0 : i32
    %c0_i32_0 = arith.constant 0 : i32
    %c0_i32_1 = arith.constant 0 : i32
    %c0_i32_2 = arith.constant 0 : i32
    return %c0_i32, %c0_i32_0, %c0_i32_1 : i32, i32, i32
  }
}

</mosaic_0001>

<bundles_post_ra>
// kernel: tpu_custom_call.1
= control target key start
LH: loop header
LB: loop body
LE: loop exit
PB: predicated region body
PF: predicated region fallthrough
CT: control target
= control target key end

     0   :  { %s2382_s15 = smov 0   ;;  %s2914_s0 = inlined_call_operand.vmem [shape: f32[2,16,16,4], index: 0, kind: input, shape index: {}]   ;;  %s2915_s1 = inlined_call_operand.vmem [shape: f32[9,4,8], index: 1, kind: input, shape index: {}]   ;;  %s2916_s2 = inlined_call_operand.vmem [shape: f32[1,8], index: 2, kind: input, shape index: {}]   ;;  %s2917_s3 = inlined_call_operand.vmem [shape: f32[1,8], index: 3, kind: input, shape index: {}]   ;;  %s2918_s4 = inlined_call_operand.vmem [shape: f32[2,64,8], index: 4, kind: output, shape index: {}]  }
   0x1 LB: > { %s2388_s16 = sadd.s32 4294967295, %s2354_s15   ;;  %p2036_p0 = scmp.ge.s32.totalorder %s2354_s15, 1  ;;  %s2354_s15 = sphi %s2382_s15, %s14_s15  }
   0x2   : > { %p157_p1 = scmp.lt.s32.totalorder %s2354_s15, 3 }
   0x4   : > { %p158_p2 = pnand %p2036_p0, %p157_p1 }
   0x5   : > { %p178_p3 = scmp.lt.s32.totalorder (!%p158_p2), %s2388_s16, 1  ;;  %p2039_p4 = scmp.ne.s32.totalorder (!%p158_p2), %s2388_s16, 0 }
   0x6   : > { %161 = sbr.rel (%p158_p2) target bundleno = 460 (0x1cc), region = 36 }
   0xb   : > { %s179_s17 = scalar_select %p178_p3, %s2388_s16, 1 }
   0xc   : > { %186 = sbr.rel (%p2039_p4) target bundleno = 44 (0x2c), region = 40 }
   0xd   : > { %s2127_s18 = sshll.u32 %s179_s17, 8 }
   0xe   : > { %s2397_s21 = scalar_lea.vmem %s2914_s0, %s2127_s18 }
  0x11   : > { %vm187_vm0 = vcmask 31744   ;;  %vm190_vm1 = vcmask 25600   ;;  %v2356_v0 = vmov 0.0  }
  0x12   : > { %188 = vst.msk [vmem:[#allocation2] sm:$0xff] %vm187_vm0, %v2356_v0  ;;  %189 = vst.msk [vmem:[#allocation2 + $0x8] sm:$0xff] %vm187_vm0, %v2356_v0 }
  0x13   : > { %192 = vst.msk [vmem:[#allocation2 + $0x18] sm:$0xff] %vm187_vm0, %v2356_v0  ;;  %193 = vst.msk [vmem:[#allocation2 + $0x20] sm:$0xff] %vm187_vm0, %v2356_v0 }
  0x14   : > { %195 = vst.msk [vmem:[#allocation2 + $0x30] sm:$0xff] %vm187_vm0, %v2356_v0  ;;  %196 = vst.msk [vmem:[#allocation2 + $0x38] sm:$0xff] %vm187_vm0, %v2356_v0 }
  0x15   : > { %198 = vst.msk [vmem:[#allocation2 + $0x48] sm:$0xff] %vm187_vm0, %v2356_v0  ;;  %199 = vst.msk [vmem:[#allocation2 + $0x50] sm:$0xff] %vm187_vm0, %v2356_v0 }
  0x16   : > { %201 = vst.msk [vmem:[#allocation2 + $0x60] sm:$0xff] %vm187_vm0, %v2356_v0  ;;  %202 = vst.msk [vmem:[#allocation2 + $0x68] sm:$0xff] %vm187_vm0, %v2356_v0 }
  0x17   : > { %204 = vst.msk [vmem:[#allocation2 + $0x78] sm:$0xff] %vm187_vm0, %v2356_v0  ;;  %205 = vst.msk [vmem:[#allocation2 + $0x80] sm:$0xff] %vm187_vm0, %v2356_v0 }
  0x18   : > { %207 = vst.msk [vmem:[#allocation2 + $0x90] sm:$0xff] %vm187_vm0, %v2356_v0  ;;  %208 = vst.msk [vmem:[#allocation2 + $0x98] sm:$0xff] %vm187_vm0, %v2356_v0 }
  0x19   : > { %210 = vst.msk [vmem:[#allocation2 + $0xa8] sm:$0xff] %vm187_vm0, %v2356_v0  ;;  %211 = vst.msk [vmem:[#allocation2 + $0xb0] sm:$0xff] %vm187_vm0, %v2356_v0 }
  0x1a   : > { %213 = vst.msk [vmem:[#allocation2 + $0xc0] sm:$0xff] %vm187_vm0, %v2356_v0  ;;  %214 = vst.msk [vmem:[#allocation2 + $0xc8] sm:$0xff] %vm187_vm0, %v2356_v0 }
  0x1b   : > { %216 = vst.msk [vmem:[#allocation2 + $0xd8] sm:$0xff] %vm187_vm0, %v2356_v0  ;;  %217 = vst.msk [vmem:[#allocation2 + $0xe0] sm:$0xff] %vm187_vm0, %v2356_v0 }
  0x1c   : > { %219 = vst.msk [vmem:[#allocation2 + $0xf0] sm:$0xff] %vm187_vm0, %v2356_v0  ;;  %220 = vst.msk [vmem:[#allocation2 + $0xf8] sm:$0xff] %vm187_vm0, %v2356_v0 }
  0x1d   : > { %222 = vst.msk [vmem:[#allocation2 + $0x108] sm:$0xff] %vm187_vm0, %v2356_v0  ;;  %223 = vst.msk [vmem:[#allocation2 + $0x110] sm:$0xff] %vm187_vm0, %v2356_v0 }
  0x1e   : > { %225 = vst.msk [vmem:[#allocation2 + $0x120] sm:$0xff] %vm187_vm0, %v2356_v0  ;;  %226 = vst.msk [vmem:[#allocation2 + $0x128] sm:$0xff] %vm187_vm0, %v2356_v0 }
  0x1f   : > { %228 = vst.msk [vmem:[#allocation2 + $0x138] sm:$0xff] %vm187_vm0, %v2356_v0  ;;  %229 = vst.msk [vmem:[#allocation2 + $0x140] sm:$0xff] %vm187_vm0, %v2356_v0 }
  0x20   : > { %231 = vst.msk [vmem:[#allocation2 + $0x150] sm:$0xff] %vm187_vm0, %v2356_v0  ;;  %232 = vst.msk [vmem:[#allocation2 + $0x158] sm:$0xff] %vm187_vm0, %v2356_v0 }
  0x21   : > { %234 = vst.msk [vmem:[#allocation2 + $0x168] sm:$0xff] %vm187_vm0, %v2356_v0  ;;  %235 = vst.msk [vmem:[#allocation2 + $0x170] sm:$0xff] %vm187_vm0, %v2356_v0 }
  0x22   : > { %237 = vst.msk [vmem:[#allocation2 + $0x180] sm:$0xff] %vm187_vm0, %v2356_v0  ;;  %238 = vst.msk [vmem:[#allocation2 + $0x188] sm:$0xff] %vm187_vm0, %v2356_v0 }
  0x23   : > { %191 = vst.msk [vmem:[#allocation2 + $0x10] sm:$0x3] %vm190_vm1, %v2356_v0  ;;  %194 = vst.msk [vmem:[#allocation2 + $0x28] sm:$0x3] %vm190_vm1, %v2356_v0 }
  0x24   : > { %197 = vst.msk [vmem:[#allocation2 + $0x40] sm:$0x3] %vm190_vm1, %v2356_v0  ;;  %200 = vst.msk [vmem:[#allocation2 + $0x58] sm:$0x3] %vm190_vm1, %v2356_v0 }
  0x25   : > { %203 = vst.msk [vmem:[#allocation2 + $0x70] sm:$0x3] %vm190_vm1, %v2356_v0  ;;  %206 = vst.msk [vmem:[#allocation2 + $0x88] sm:$0x3] %vm190_vm1, %v2356_v0 }
  0x26   : > { %209 = vst.msk [vmem:[#allocation2 + $0xa0] sm:$0x3] %vm190_vm1, %v2356_v0  ;;  %212 = vst.msk [vmem:[#allocation2 + $0xb8] sm:$0x3] %vm190_vm1, %v2356_v0 }
  0x27   : > { %215 = vst.msk [vmem:[#allocation2 + $0xd0] sm:$0x3] %vm190_vm1, %v2356_v0  ;;  %218 = vst.msk [vmem:[#allocation2 + $0xe8] sm:$0x3] %vm190_vm1, %v2356_v0 }
  0x28   : > { %221 = vst.msk [vmem:[#allocation2 + $0x100] sm:$0x3] %vm190_vm1, %v2356_v0  ;;  %224 = vst.msk [vmem:[#allocation2 + $0x118] sm:$0x3] %vm190_vm1, %v2356_v0 }
  0x29   : > { %227 = vst.msk [vmem:[#allocation2 + $0x130] sm:$0x3] %vm190_vm1, %v2356_v0  ;;  %230 = vst.msk [vmem:[#allocation2 + $0x148] sm:$0x3] %vm190_vm1, %v2356_v0 }
  0x2a   : > { %233 = vst.msk [vmem:[#allocation2 + $0x160] sm:$0x3] %vm190_vm1, %v2356_v0  ;;  %236 = vst.msk [vmem:[#allocation2 + $0x178] sm:$0x3] %vm190_vm1, %v2356_v0 }
  0x2b   : > { %239 = vst.msk [vmem:[#allocation2 + $0x190] sm:$0x3] %vm190_vm1, %v2356_v0 }
  0x2c PF: > { %v342_v1 = vld [vmem:[%s2915_s1 + $0x4] sm:$0xf]  ;;  %vm405_vm2 = vcmask 1043456   ;;  %vm308_vm3 = vcmask 31744   ;;  %v257_v3 = vld [vmem:[%s2397_s21 + $0x70] sm:$0xff]  ;;  %v258_v4 = vld [vmem:[%s2397_s21 + $0x78] sm:$0xff] }
  0x2d   : > { %v366_v2 = vld [vmem:[#allocation2 + $0x1] ss:$2 sm:$0xff]  ;;  %2335 = vmatprep.subr.msk.mxu1 %vm405_vm2, %v342_v1  ;;  %2209 = vmatprep.subr.msk.mxu0 %vm405_vm2, %v342_v1  ;;  %v289_v6 = vmax.f32 %v257_v3, 0.0  ;;  %v290_v7 = vmax.f32 %v258_v4, 0.0  ;;  %v245_v8 = vld [vmem:[%s2397_s21 + $0x10] sm:$0xff]  ;;  %v246_v9 = vld [vmem:[%s2397_s21 + $0x18] sm:$0xff] }
  0x2e   : > { %v2461_v5 = vld [vmem:[%s2915_s1] sm:$0xf]  ;;  %2336 = vmatpush3.msk.msra.mxu1 %vm405_vm2, %v342_v1  ;;  %2210 = vmatpush3.msk.msra.mxu0 %vm405_vm2, %v342_v1  ;;  %v261_v10 = vld [vmem:[%s2397_s21 + $0x90] sm:$0xff]  ;;  %v277_v11 = vmax.f32 %v245_v8, 0.0  ;;  %v278_v12 = vmax.f32 %v246_v9, 0.0  ;;  %v262_v13 = vld [vmem:[%s2397_s21 + $0x98] sm:$0xff] }
  0x2f   : > { %2211 = vmatprep.mubr.msk.f32.mxu0 %vm308_vm3, %v366_v2  ;;  %2223 = vmatprep.subr.msk.mxu1 %vm405_vm2, %v2461_v5  ;;  %v293_v14 = vmax.f32 %v261_v10, 0.0  ;;  %v343_v15 = vld [vmem:[%s2915_s1 + $0x8] sm:$0xf]  ;;  %323 = vst.msk [vmem:[#allocation2 + $0xc1] sm:$0xff] %vm308_vm3, %v289_v6  ;;  %324 = vst.msk [vmem:[#allocation2 + $0xc9] sm:$0xff] %vm308_vm3, %v290_v7  ;;  %v294_v16 = vmax.f32 %v262_v13, 0.0 }
  0x30   : > { %2237 = vmatprep.subr.msk.mxu0 %vm405_vm2, %v343_v15  ;;  %v249_v17 = vld [vmem:[%s2397_s21 + $0x30] sm:$0xff]  ;;  %v250_v18 = vld [vmem:[%s2397_s21 + $0x38] sm:$0xff]  ;;  %311 = vst.msk [vmem:[#allocation2 + $0x31] sm:$0xff] %vm308_vm3, %v277_v11  ;;  %312 = vst.msk [vmem:[#allocation2 + $0x39] sm:$0xff] %vm308_vm3, %v278_v12  ;;  %s2121_s14 = sshll.u32 %s2388_s16, 6  ;;  %vm1739_vm4 = vcmask 64512  }
  0x31   : > { %v265_v19 = vld [vmem:[%s2397_s21 + $0xb0] sm:$0xff]  ;;  %327 = vst.msk [vmem:[#allocation2 + $0xf1] sm:$0xff] %vm308_vm3, %v293_v14  ;;  %v281_v20 = vmax.f32 %v249_v17, 0.0  ;;  %v282_v21 = vmax.f32 %v250_v18, 0.0  ;;  %v266_v22 = vld [vmem:[%s2397_s21 + $0xb8] sm:$0xff]  ;;  %328 = vst.msk [vmem:[#allocation2 + $0xf9] sm:$0xff] %vm308_vm3, %v294_v16  ;;  %s2660_s19 = scalar_lea.vmem %s2918_s4, %s2121_s14 }
  0x32   : > { %v297_v23 = vmax.f32 %v265_v19, 0.0  ;;  %v253_v24 = vld [vmem:[%s2397_s21 + $0x50] sm:$0xff]  ;;  %v254_v25 = vld [vmem:[%s2397_s21 + $0x58] sm:$0xff]  ;;  %v298_v26 = vmax.f32 %v266_v22, 0.0  ;;  %v243_v31 = vld [vmem:[%s2397_s21] sm:$0xff]  ;;  %p2122_p5 = scmp.ne.s32.totalorder %s2388_s16, 1 }
  0x33   : > { %v285_v27 = vmax.f32 %v253_v24, 0.0  ;;  %v286_v28 = vmax.f32 %v254_v25, 0.0  ;;  %v269_v29 = vld [vmem:[%s2397_s21 + $0xd0] sm:$0xff]  ;;  %v270_v30 = vld [vmem:[%s2397_s21 + $0xd8] sm:$0xff]  ;;  %315 = vst.msk [vmem:[#allocation2 + $0x61] sm:$0xff] %vm308_vm3, %v281_v20  ;;  %316 = vst.msk [vmem:[#allocation2 + $0x69] sm:$0xff] %vm308_vm3, %v282_v21 }
  0x34   : > { %331 = vst.msk [vmem:[#allocation2 + $0x121] sm:$0xff] %vm308_vm3, %v297_v23  ;;  %v301_v32 = vmax.f32 %v269_v29, 0.0  ;;  %v302_v33 = vmax.f32 %v270_v30, 0.0  ;;  %332 = vst.msk [vmem:[#allocation2 + $0x129] sm:$0xff] %vm308_vm3, %v298_v26  ;;  %v244_v34 = vld [vmem:[%s2397_s21 + $0x8] sm:$0xff]  ;;  %v275_v35 = vmax.f32 %v243_v31, 0.0 }
  0x35   : > { %319 = vst.msk [vmem:[#allocation2 + $0x91] sm:$0xff] %vm308_vm3, %v285_v27  ;;  %320 = vst.msk [vmem:[#allocation2 + $0x99] sm:$0xff] %vm308_vm3, %v286_v28  ;;  %v276_v36 = vmax.f32 %v244_v34, 0.0  ;;  %v247_v37 = vld [vmem:[%s2397_s21 + $0x20] sm:$0xff]  ;;  %v248_v38 = vld [vmem:[%s2397_s21 + $0x28] sm:$0xff] }
  0x36   : > { %335 = vst.msk [vmem:[#allocation2 + $0x151] sm:$0xff] %vm308_vm3, %v301_v32  ;;  %336 = vst.msk [vmem:[#allocation2 + $0x159] sm:$0xff] %vm308_vm3, %v302_v33  ;;  %v279_v39 = vmax.f32 %v247_v37, 0.0  ;;  %v280_v40 = vmax.f32 %v248_v38, 0.0  ;;  %v374_v41 = vld [vmem:[#allocation2 + $0xc1] ss:$2 sm:$0xff] }
  0x37   : > { %309 = vst.msk [vmem:[#allocation2 + $0x19] sm:$0xff] %vm308_vm3, %v275_v35  ;;  %310 = vst.msk [vmem:[#allocation2 + $0x21] sm:$0xff] %vm308_vm3, %v276_v36  ;;  %2217 = vmatprep.mubr.msk.f32.mxu1 %vm308_vm3, %v374_v41  ;;  %v368_v42 = vld [vmem:[#allocation2 + $0x31] ss:$2 sm:$0xff]  ;;  %v647_v44 = vld [vmem:[#allocation2 + $0x2] ss:$2 sm:$0xff] }
  0x38   : > { %313 = vst.msk [vmem:[#allocation2 + $0x49] sm:$0xff] %vm308_vm3, %v279_v39  ;;  %314 = vst.msk [vmem:[#allocation2 + $0x51] sm:$0xff] %vm308_vm3, %v280_v40  ;;  %2212 = vmatmul.mubr.msk.f32.vlgmr.msra.gmra.mxu0 %vm308_vm3, %v368_v42  ;;  %v376_v43 = vld [vmem:[#allocation2 + $0xf1] ss:$2 sm:$0xff]  ;;  %v344_v45 = vld [vmem:[%s2915_s1 + $0xc] sm:$0xf] }
  0x39   : > { %2218 = vmatmul.mubr.msk.f32.vlgmr.msra.gmra.mxu1 %vm308_vm3, %v376_v43  ;;  %2238 = vmatpush3.msk.msra.mxu0 %vm405_vm2, %v343_v15  ;;  %v345_v47 = vld [vmem:[%s2915_s1 + $0x10] sm:$0xf]  ;;  %v251_v48 = vld [vmem:[%s2397_s21 + $0x40] sm:$0xff]  ;;  %v252_v51 = vld [vmem:[%s2397_s21 + $0x48] sm:$0xff] }
  0x3a   : > { %v370_v46 = vld [vmem:[#allocation2 + $0x61] ss:$2 sm:$0xff]  ;;  %2224 = vmatpush3.msk.msra.mxu1 %vm405_vm2, %v2461_v5  ;;  %v350_v53 = vld [vmem:[#allocation2] ss:$2 sm:$0xff]  ;;  %2265 = vmatprep.subr.msk.mxu0 %vm405_vm2, %v345_v47  ;;  %v352_v54 = vld [vmem:[#allocation2 + $0x30] ss:$2 sm:$0xff] }
  0x3b   : > { %2214 = vmatprep.mubr.msk.f32.mxu0 %vm308_vm3, %v370_v46  ;;  %v378_v49 = vld [vmem:[#allocation2 + $0x121] ss:$2 sm:$0xff]  ;;  %2251 = vmatprep.subr.msk.mxu1 %vm405_vm2, %v344_v45  ;;  %v649_v55 = vld [vmem:[#allocation2 + $0x32] ss:$2 sm:$0xff]  ;;  %v283_v56 = vmax.f32 %v251_v48, 0.0  ;;  %v284_v57 = vmax.f32 %v252_v51, 0.0 }
  0x3c   : > { %v372_v50 = vld [vmem:[#allocation2 + $0x91] ss:$2 sm:$0xff]  ;;  %2220 = vmatprep.mubr.msk.f32.mxu1 %vm308_vm3, %v378_v49  ;;  %v354_v58 = vld [vmem:[#allocation2 + $0x60] ss:$2 sm:$0xff]  ;;  %v356_v17 = vld [vmem:[#allocation2 + $0x90] ss:$2 sm:$0xff] }
  0x3d   : > { %v380_v52 = vld [vmem:[#allocation2 + $0x151] ss:$2 sm:$0xff]  ;;  %2215 = vmatmul.mubr.msk.f32.gmra.mxu0 %vm308_vm3, %v372_v50  ;;  %v651_v59 = vld [vmem:[#allocation2 + $0x62] ss:$2 sm:$0xff]  ;;  %v653_v62 = vld [vmem:[#allocation2 + $0x92] ss:$2 sm:$0xff] }
  0x3e   : > { %2221 = vmatmul.mubr.msk.f32.gmra.mxu1 %vm308_vm3, %v380_v52  ;;  %2239 = vmatprep.mubr.msk.f32.mxu0 %vm308_vm3, %v647_v44  ;;  %v2531_v60 = vld [vmem:[%s2915_s1 + $0x14] sm:$0xf]  ;;  %v255_v61 = vld [vmem:[%s2397_s21 + $0x60] sm:$0xff]  ;;  %v2537_v63 = vld [vmem:[%s2915_s1 + $0x18] sm:$0xf]  ;;  %317 = vst.msk [vmem:[#allocation2 + $0x79] sm:$0xff] %vm308_vm3, %v283_v56 }
  0x3f   : > { %2225 = vmatprep.mubr.msk.f32.mxu1 %vm308_vm3, %v350_v53  ;;  %318 = vst.msk [vmem:[#allocation2 + $0x81] sm:$0xff] %vm308_vm3, %v284_v57  ;;  %v256_v0 = vld [vmem:[%s2397_s21 + $0x68] sm:$0xff]  ;;  %v287_v1 = vmax.f32 %v255_v61, 0.0  ;;  %v259_v2 = vld [vmem:[%s2397_s21 + $0x80] sm:$0xff]  ;;  %v273_v22 = vld [vmem:[%s2397_s21 + $0xf0] sm:$0xff] }
  0x40   : > { %v260_v3 = vld [vmem:[%s2397_s21 + $0x88] sm:$0xff]  ;;  %v288_v5 = vmax.f32 %v256_v0, 0.0  ;;  %v291_v6 = vmax.f32 %v259_v2, 0.0  ;;  %v263_v8 = vld [vmem:[%s2397_s21 + $0xa0] sm:$0xff]  ;;  %v360_v24 = vld [vmem:[#allocation2 + $0xf0] ss:$2 sm:$0xff] }
  0x41   : > { %2240 = vmatmul.mubr.msk.f32.vlgmr.msra.gmra.mxu0 %vm308_vm3, %v649_v55  ;;  %v655_v4 = vld [vmem:[#allocation2 + $0xc2] ss:$2 sm:$0xff]  ;;  %v292_v7 = vmax.f32 %v260_v3, 0.0  ;;  %321 = vst.msk [vmem:[#allocation2 + $0xa9] sm:$0xff] %vm308_vm3, %v287_v1  ;;  %v295_v11 = vmax.f32 %v263_v8, 0.0  ;;  %v274_v27 = vld [vmem:[%s2397_s21 + $0xf8] sm:$0xff] }
  0x42   : > { %v264_v9 = vld [vmem:[%s2397_s21 + $0xa8] sm:$0xff]  ;;  %v267_v10 = vld [vmem:[%s2397_s21 + $0xc0] sm:$0xff]  ;;  %2226 = vmatmul.mubr.msk.f32.vlgmr.msra.gmra.mxu1 %vm308_vm3, %v352_v54  ;;  %2266 = vmatpush3.msk.msra.mxu0 %vm405_vm2, %v345_v47  ;;  %322 = vst.msk [vmem:[#allocation2 + $0xb1] sm:$0xff] %vm308_vm3, %v288_v5  ;;  %325 = vst.msk [vmem:[#allocation2 + $0xd9] sm:$0xff] %vm308_vm3, %v291_v6  ;;  %v305_v28 = vmax.f32 %v273_v22, 0.0  ;;  %v306_v29 = vmax.f32 %v274_v27, 0.0 }
  0x43   : > { %v296_v12 = vmax.f32 %v264_v9, 0.0  ;;  %v268_v13 = vld [vmem:[%s2397_s21 + $0xc8] sm:$0xff]  ;;  %v299_v14 = vmax.f32 %v267_v10, 0.0  ;;  %v271_v15 = vld [vmem:[%s2397_s21 + $0xe0] sm:$0xff]  ;;  %2252 = vmatpush3.msk.msra.mxu1 %vm405_vm2, %v344_v45  ;;  %2228 = vmatprep.mubr.msk.f32.mxu1 %vm308_vm3, %v354_v58  ;;  %326 = vst.msk [vmem:[#allocation2 + $0xe1] sm:$0xff] %vm308_vm3, %v292_v7  ;;  %329 = vst.msk [vmem:[#allocation2 + $0x109] sm:$0xff] %vm308_vm3, %v295_v11 }
  0x44   : > { %v272_v16 = vld [vmem:[%s2397_s21 + $0xe8] sm:$0xff]  ;;  %v300_v18 = vmax.f32 %v268_v13, 0.0  ;;  %v303_v19 = vmax.f32 %v271_v15, 0.0  ;;  %2242 = vmatprep.mubr.msk.f32.mxu0 %vm308_vm3, %v651_v59  ;;  %2279 = vmatprep.subr.msk.mxu1 %vm405_vm2, %v2531_v60  ;;  %v657_v23 = vld [vmem:[#allocation2 + $0xf2] ss:$2 sm:$0xff]  ;;  %339 = vst.msk [vmem:[#allocation2 + $0x181] sm:$0xff] %vm308_vm3, %v305_v28 }
  0x45   : > { %v304_v20 = vmax.f32 %v272_v16, 0.0  ;;  %v358_v21 = vld [vmem:[#allocation2 + $0xc0] ss:$2 sm:$0xff]  ;;  %330 = vst.msk [vmem:[#allocation2 + $0x111] sm:$0xff] %vm308_vm3, %v296_v12  ;;  %333 = vst.msk [vmem:[#allocation2 + $0x139] sm:$0xff] %vm308_vm3, %v299_v14  ;;  %2243 = vmatmul.mubr.msk.f32.gmra.mxu0 %vm308_vm3, %v653_v62  ;;  %2293 = vmatprep.subr.msk.mxu0 %vm405_vm2, %v2537_v63 }
  0x46   : > { %334 = vst.msk [vmem:[#allocation2 + $0x141] sm:$0xff] %vm308_vm3, %v300_v18  ;;  %337 = vst.msk [vmem:[#allocation2 + $0x169] sm:$0xff] %vm308_vm3, %v303_v19  ;;  %2229 = vmatmul.mubr.msk.f32.gmra.mxu1 %vm308_vm3, %v356_v17  ;;  %2245 = vmatprep.mubr.msk.f32.mxu0 %vm308_vm3, %v655_v4  ;;  %v659_v25 = vld [vmem:[#allocation2 + $0x122] ss:$2 sm:$0xff]  ;;  %v661_v30 = vld [vmem:[#allocation2 + $0x152] ss:$2 sm:$0xff] }
  0x47   : > { %338 = vst.msk [vmem:[#allocation2 + $0x171] sm:$0xff] %vm308_vm3, %v304_v20  ;;  %2231 = vmatprep.mubr.msk.f32.mxu1 %vm308_vm3, %v358_v21  ;;  %v362_v26 = vld [vmem:[#allocation2 + $0x120] ss:$2 sm:$0xff]  ;;  %v364_v31 = vld [vmem:[#allocation2 + $0x150] ss:$2 sm:$0xff]  ;;  %340 = vst.msk [vmem:[#allocation2 + $0x189] sm:$0xff] %vm308_vm3, %v306_v29 }
  0x48   : > { %v958_v32 = vld [vmem:[#allocation2 + $0x19] ss:$2 sm:$0xff]  ;;  %v802_v33 = vld [vmem:[#allocation2 + $0x18] ss:$2 sm:$0xff]  ;;  %v960_v34 = vld [vmem:[#allocation2 + $0x49] ss:$2 sm:$0xff] }
  0x49   : > { %2246 = vmatmul.mubr.msk.f32.gmra.mxu0 %vm308_vm3, %v657_v23  ;;  %v804_v35 = vld [vmem:[#allocation2 + $0x48] ss:$2 sm:$0xff]  ;;  %v806_v36 = vld [vmem:[#allocation2 + $0x78] ss:$2 sm:$0xff]  ;;  %v962_v37 = vld [vmem:[#allocation2 + $0x79] ss:$2 sm:$0xff] }
  0x4a   : > { %2232 = vmatmul.mubr.msk.f32.gmra.mxu1 %vm308_vm3, %v360_v24  ;;  %2248 = vmatprep.mubr.msk.f32.mxu0 %vm308_vm3, %v659_v25  ;;  %v348_v38 = vld [vmem:[%s2915_s1 + $0x1c] sm:$0xf]  ;;  %v964_v39 = vld [vmem:[#allocation2 + $0xa9] ss:$2 sm:$0xff]  ;;  %v349_v40 = vld [vmem:[%s2915_s1 + $0x20] sm:$0xf] }
  0x4b   : > { %2234 = vmatprep.mubr.msk.f32.mxu1 %vm308_vm3, %v362_v26  ;;  %v808_v41 = vld [vmem:[#allocation2 + $0xa8] ss:$2 sm:$0xff]  ;;  %v966_v42 = vld [vmem:[#allocation2 + $0xd9] ss:$2 sm:$0xff]  ;;  %v810_v43 = vld [vmem:[#allocation2 + $0xd8] ss:$2 sm:$0xff] }
  0x4c   : > { %v968_v44 = vld [vmem:[#allocation2 + $0x109] ss:$2 sm:$0xff]  ;;  %v812_v45 = vld [vmem:[#allocation2 + $0x108] ss:$2 sm:$0xff] }
  0x4d   : > { %2249 = vmatmul.mubr.msk.f32.gmra.mxu0 %vm308_vm3, %v661_v30  ;;  %v970_v46 = vld [vmem:[#allocation2 + $0x139] ss:$2 sm:$0xff]  ;;  %v814_v47 = vld [vmem:[#allocation2 + $0x138] ss:$2 sm:$0xff] }
  0x4e   : > { %2235 = vmatmul.mubr.msk.f32.gmra.mxu1 %vm308_vm3, %v364_v31  ;;  %2267 = vmatprep.mubr.msk.f32.mxu0 %vm308_vm3, %v958_v32  ;;  %v972_v48 = vld [vmem:[#allocation2 + $0x169] ss:$2 sm:$0xff]  ;;  %v816_v49 = vld [vmem:[#allocation2 + $0x168] ss:$2 sm:$0xff] }
  0x4f   : > { %2253 = vmatprep.mubr.msk.f32.mxu1 %vm308_vm3, %v802_v33  ;;  %v1270_v50 = vld [vmem:[#allocation2 + $0x30] ss:$2 sm:$0xff]  ;;  %v1272_v52 = vld [vmem:[#allocation2 + $0x60] ss:$2 sm:$0xff]  ;;  %v1426_v3 = vld [vmem:[#allocation2 + $0x31] ss:$2 sm:$0xff] }
  0x50   : > { %v1114_v51 = vld [vmem:[#allocation2 + $0x1a] ss:$2 sm:$0xff]  ;;  %v1116_v53 = vld [vmem:[#allocation2 + $0x4a] ss:$2 sm:$0xff]  ;;  %v1428_v5 = vld [vmem:[#allocation2 + $0x61] ss:$2 sm:$0xff] }
  0x51   : > { %2268 = vmatmul.mubr.msk.f32.vlgmr.msra.gmra.mxu0 %vm308_vm3, %v960_v34  ;;  %v1118_v54 = vld [vmem:[#allocation2 + $0x7a] ss:$2 sm:$0xff]  ;;  %v1120_v57 = vld [vmem:[#allocation2 + $0xaa] ss:$2 sm:$0xff]  ;;  %v1430_v7 = vld [vmem:[#allocation2 + $0x91] ss:$2 sm:$0xff] }
  0x52   : > { %2254 = vmatmul.mubr.msk.f32.vlgmr.msra.gmra.mxu1 %vm308_vm3, %v804_v35  ;;  %2294 = vmatpush3.msk.msra.mxu0 %vm405_vm2, %v2537_v63  ;;  %v1274_v55 = vld [vmem:[#allocation2 + $0x90] ss:$2 sm:$0xff]  ;;  %v1276_v56 = vld [vmem:[#allocation2 + $0xc0] ss:$2 sm:$0xff]  ;;  %v1432_v9 = vld [vmem:[#allocation2 + $0xc1] ss:$2 sm:$0xff] }
  0x53   : > { %2280 = vmatpush3.msk.msra.mxu1 %vm405_vm2, %v2531_v60  ;;  %2256 = vmatprep.mubr.msk.f32.mxu1 %vm308_vm3, %v806_v36  ;;  %v1278_v58 = vld [vmem:[#allocation2 + $0xf0] ss:$2 sm:$0xff]  ;;  %v1280_v60 = vld [vmem:[#allocation2 + $0x120] ss:$2 sm:$0xff]  ;;  %v1434_v11 = vld [vmem:[#allocation2 + $0xf1] ss:$2 sm:$0xff] }
  0x54   : > { %2270 = vmatprep.mubr.msk.f32.mxu0 %vm308_vm3, %v962_v37  ;;  %2307 = vmatprep.subr.msk.mxu1 %vm405_vm2, %v348_v38  ;;  %v1122_v59 = vld [vmem:[#allocation2 + $0xda] ss:$2 sm:$0xff]  ;;  %v1124_v61 = vld [vmem:[#allocation2 + $0x10a] ss:$2 sm:$0xff]  ;;  %v1436_v13 = vld [vmem:[#allocation2 + $0x121] ss:$2 sm:$0xff] }
  0x55   : > { %2271 = vmatmul.mubr.msk.f32.gmra.mxu0 %vm308_vm3, %v964_v39  ;;  %2321 = vmatprep.subr.msk.mxu0 %vm405_vm2, %v349_v40  ;;  %v1282_v62 = vld [vmem:[#allocation2 + $0x150] ss:$2 sm:$0xff]  ;;  %v1284_v0 = vld [vmem:[#allocation2 + $0x180] ss:$2 sm:$0xff]  ;;  %v1438_v15 = vld [vmem:[#allocation2 + $0x151] ss:$2 sm:$0xff] }
  0x56   : > { %2257 = vmatmul.mubr.msk.f32.gmra.mxu1 %vm308_vm3, %v808_v41  ;;  %2273 = vmatprep.mubr.msk.f32.mxu0 %vm308_vm3, %v966_v42  ;;  %v1126_v63 = vld [vmem:[#allocation2 + $0x13a] ss:$2 sm:$0xff]  ;;  %v1128_v1 = vld [vmem:[#allocation2 + $0x16a] ss:$2 sm:$0xff]  ;;  %v1440_v17 = vld [vmem:[#allocation2 + $0x181] ss:$2 sm:$0xff] }
  0x57   : > { %2259 = vmatprep.mubr.msk.f32.mxu1 %vm308_vm3, %v810_v43  ;;  %v1582_v2 = vld [vmem:[#allocation2 + $0x32] ss:$2 sm:$0xff]  ;;  %v1584_v4 = vld [vmem:[#allocation2 + $0x62] ss:$2 sm:$0xff] }
  0x58   : > { %v1586_v6 = vld [vmem:[#allocation2 + $0x92] ss:$2 sm:$0xff]  ;;  %v1588_v8 = vld [vmem:[#allocation2 + $0xc2] ss:$2 sm:$0xff] }
  0x59   : > { %2274 = vmatmul.mubr.msk.f32.gmra.mxu0 %vm308_vm3, %v968_v44  ;;  %v1590_v10 = vld [vmem:[#allocation2 + $0xf2] ss:$2 sm:$0xff]  ;;  %v1592_v12 = vld [vmem:[#allocation2 + $0x122] ss:$2 sm:$0xff] }
  0x5a   : > { %2260 = vmatmul.mubr.msk.f32.gmra.mxu1 %vm308_vm3, %v812_v45  ;;  %2276 = vmatprep.mubr.msk.f32.mxu0 %vm308_vm3, %v970_v46  ;;  %v1594_v14 = vld [vmem:[#allocation2 + $0x152] ss:$2 sm:$0xff]  ;;  %v1596_v16 = vld [vmem:[#allocation2 + $0x182] ss:$2 sm:$0xff] }
  0x5b   : > { %2262 = vmatprep.mubr.msk.f32.mxu1 %vm308_vm3, %v814_v47 }
  0x5d   : > { %2277 = vmatmul.mubr.msk.f32.gmra.mxu0 %vm308_vm3, %v972_v48 }
  0x5e   : > { %2263 = vmatmul.mubr.msk.f32.gmra.mxu1 %vm308_vm3, %v816_v49  ;;  %2295 = vmatprep.mubr.msk.f32.mxu0 %vm308_vm3, %v1270_v50 }
  0x5f   : > { %2281 = vmatprep.mubr.msk.f32.mxu1 %vm308_vm3, %v1114_v51 }
  0x61   : > { %2296 = vmatmul.mubr.msk.f32.vlgmr.msra.gmra.mxu0 %vm308_vm3, %v1272_v52 }
  0x62   : > { %2282 = vmatmul.mubr.msk.f32.vlgmr.msra.gmra.mxu1 %vm308_vm3, %v1116_v53  ;;  %2322 = vmatpush3.msk.msra.mxu0 %vm405_vm2, %v349_v40 }
  0x63   : > { %2308 = vmatpush3.msk.msra.mxu1 %vm405_vm2, %v348_v38  ;;  %2284 = vmatprep.mubr.msk.f32.mxu1 %vm308_vm3, %v1118_v54 }
  0x64   : > { %2298 = vmatprep.mubr.msk.f32.mxu0 %vm308_vm3, %v1274_v55 }
  0x65   : > { %2299 = vmatmul.mubr.msk.f32.gmra.mxu0 %vm308_vm3, %v1276_v56 }
  0x66   : > { %2285 = vmatmul.mubr.msk.f32.gmra.mxu1 %vm308_vm3, %v1120_v57  ;;  %2301 = vmatprep.mubr.msk.f32.mxu0 %vm308_vm3, %v1278_v58 }
  0x67   : > { %2287 = vmatprep.mubr.msk.f32.mxu1 %vm308_vm3, %v1122_v59 }
  0x69   : > { %2302 = vmatmul.mubr.msk.f32.gmra.mxu0 %vm308_vm3, %v1280_v60 }
  0x6a   : > { %2288 = vmatmul.mubr.msk.f32.gmra.mxu1 %vm308_vm3, %v1124_v61  ;;  %2304 = vmatprep.mubr.msk.f32.mxu0 %vm308_vm3, %v1282_v62 }
  0x6b   : > { %2290 = vmatprep.mubr.msk.f32.mxu1 %vm308_vm3, %v1126_v63 }
  0x6d   : > { %2305 = vmatmul.mubr.msk.f32.gmra.mxu0 %vm308_vm3, %v1284_v0 }
  0x6e   : > { %2291 = vmatmul.mubr.msk.f32.gmra.mxu1 %vm308_vm3, %v1128_v1  ;;  %2323 = vmatprep.mubr.msk.f32.mxu0 %vm308_vm3, %v1582_v2 }
  0x6f   : > { %2309 = vmatprep.mubr.msk.f32.mxu1 %vm308_vm3, %v1426_v3 }
  0x71   : > { %2324 = vmatmul.mubr.msk.f32.vlgmr.msra.gmra.mxu0 %vm308_vm3, %v1584_v4 }
  0x72   : > { %2310 = vmatmul.mubr.msk.f32.vlgmr.msra.gmra.mxu1 %vm308_vm3, %v1428_v5  ;;  %2326 = vmatprep.mubr.msk.f32.mxu0 %vm308_vm3, %v1586_v6 }
  0x73   : > { %2312 = vmatprep.mubr.msk.f32.mxu1 %vm308_vm3, %v1430_v7 }
  0x75   : > { %2327 = vmatmul.mubr.msk.f32.gmra.mxu0 %vm308_vm3, %v1588_v8 }
  0x76   : > { %2313 = vmatmul.mubr.msk.f32.gmra.mxu1 %vm308_vm3, %v1432_v9  ;;  %2329 = vmatprep.mubr.msk.f32.mxu0 %vm308_vm3, %v1590_v10 }
  0x77   : > { %2315 = vmatprep.mubr.msk.f32.mxu1 %vm308_vm3, %v1434_v11 }
  0x79   : > { %2330 = vmatmul.mubr.msk.f32.gmra.mxu0 %vm308_vm3, %v1592_v12 }
  0x7a   : > { %2316 = vmatmul.mubr.msk.f32.gmra.mxu1 %vm308_vm3, %v1436_v13  ;;  %2332 = vmatprep.mubr.msk.f32.mxu0 %vm308_vm3, %v1594_v14 }
  0x7b   : > { %2318 = vmatprep.mubr.msk.f32.mxu1 %vm308_vm3, %v1438_v15 }
  0x7d   : > { %2333 = vmatmul.mubr.msk.f32.gmra.mxu0 %vm308_vm3, %v1596_v16 }
  0x7e   : > { %2319 = vmatmul.mubr.msk.f32.gmra.mxu1 %vm308_vm3, %v1440_v17 }
  0xf8   : > { %v2213_v18 = vpop.f32.mrf.mxu0 }
  0xf9   : > { %v2219_v19 = vpop.f32.mrf.mxu1 }
  0xfa   : > { %v475_v20 = vpop.f32.mrf.mxu0 }
  0xfb   : > { %v495_v21 = vpop.f32.mrf.mxu1 }
  0xfd   : > { %v2216_v22 = vpop.f32.mrf.mxu0 }
  0xfe   : > { %v2222_v23 = vpop.f32.mrf.mxu1 }
  0xff   : > { %v485_v24 = vpop.f32.mrf.mxu0 }
 0x100   : > { %v2646_v25 = vpop.f32.mrf.mxu1 }
 0x101   : > { %v2241_v26 = vpop.f32.mrf.mxu0 }
 0x102   : > { %v2227_v27 = vpop.f32.mrf.mxu1 }
 0x103   : > { %v755_v28 = vpop.f32.mrf.mxu0  ;;  %v613_v58 = vadd.f32 %v2227_v27, %v2213_v18 }
 0x104   : > { %v607_v29 = vpop.f32.mrf.mxu1 }
 0x105   : > { %v2244_v30 = vpop.f32.mrf.mxu0  ;;  %v608_v61 = vadd.f32 %v607_v29, %v475_v20  ;;  %v795_v0 = vadd.f32 %v2241_v26, %v613_v58 }
 0x106   : > { %v2230_v31 = vpop.f32.mrf.mxu1 }
 0x107   : > { %v765_v32 = vpop.f32.mrf.mxu0  ;;  %v623_v1 = vadd.f32 %v2230_v31, %v2216_v22  ;;  %v794_v4 = vadd.f32 %v755_v28, %v608_v61 }
 0x108   : > { %v617_v33 = vpop.f32.mrf.mxu1 }
 0x109   : > { %v2247_v34 = vpop.f32.mrf.mxu0  ;;  %v618_v5 = vadd.f32 %v617_v33, %v485_v24  ;;  %v797_v9 = vadd.f32 %v2244_v30, %v623_v1 }
 0x10a   : > { %v2233_v35 = vpop.f32.mrf.mxu1 }
 0x10b   : > { %v775_v36 = vpop.f32.mrf.mxu0  ;;  %v633_v10 = vadd.f32 %v2233_v35, %v2219_v19  ;;  %v796_v15 = vadd.f32 %v765_v32, %v618_v5 }
 0x10c   : > { %v627_v37 = vpop.f32.mrf.mxu1 }
 0x10d   : > { %v2250_v38 = vpop.f32.mrf.mxu0  ;;  %v628_v13 = vadd.f32 %v627_v37, %v495_v21  ;;  %v799_v22 = vadd.f32 %v2247_v34, %v633_v10 }
 0x10e   : > { %v2236_v39 = vpop.f32.mrf.mxu1 }
 0x10f   : > { %v2648_v40 = vpop.f32.mrf.mxu0  ;;  %v643_v20 = vadd.f32 %v2236_v39, %v2222_v23  ;;  %v798_v31 = vadd.f32 %v775_v36, %v628_v13 }
 0x110   : > { %v637_v41 = vpop.f32.mrf.mxu1 }
 0x111   : > { %v2269_v42 = vpop.f32.mrf.mxu0  ;;  %v638_v30 = vadd.f32 %v637_v41, %v2646_v25  ;;  %v801_v32 = vadd.f32 %v2250_v38, %v643_v20 }
 0x112   : > { %v2255_v43 = vpop.f32.mrf.mxu1 }
 0x113   : > { %v1066_v44 = vpop.f32.mrf.mxu0  ;;  %v950_v6 = vadd.f32 %v2255_v43, %v795_v0 }
 0x114   : > { %v910_v45 = vpop.f32.mrf.mxu1 }
 0x115   : > { %v2272_v46 = vpop.f32.mrf.mxu0  ;;  %v949_v11 = vadd.f32 %v910_v45, %v794_v4  ;;  %v1106_v16 = vadd.f32 %v2269_v42, %v950_v6 }
 0x116   : > { %v2258_v47 = vpop.f32.mrf.mxu1 }
 0x117   : > { %v1076_v48 = vpop.f32.mrf.mxu0  ;;  %v952_v17 = vadd.f32 %v2258_v47, %v797_v9  ;;  %v1105_v27 = vadd.f32 %v1066_v44, %v949_v11  ;;  %v800_v44 = vadd.f32 %v2648_v40, %v638_v30 }
 0x118   : > { %v920_v49 = vpop.f32.mrf.mxu1 }
 0x119   : > { %v2275_v50 = vpop.f32.mrf.mxu0  ;;  %v951_v29 = vadd.f32 %v920_v49, %v796_v15  ;;  %v1108_v33 = vadd.f32 %v2272_v46, %v952_v17 }
 0x11a   : > { %v2261_v51 = vpop.f32.mrf.mxu1 }
 0x11b   : > { %v1086_v52 = vpop.f32.mrf.mxu0  ;;  %v954_v35 = vadd.f32 %v2261_v51, %v799_v22  ;;  %v1107_v45 = vadd.f32 %v1076_v48, %v951_v29 }
 0x11c   : > { %v930_v53 = vpop.f32.mrf.mxu1 }
 0x11d   : > { %v2650_v54 = vpop.f32.mrf.mxu0  ;;  %v953_v42 = vadd.f32 %v930_v53, %v798_v31  ;;  %v1110_v36 = vadd.f32 %v2275_v50, %v954_v35 }
 0x11e   : > { %v2264_v55 = vpop.f32.mrf.mxu1 }
 0x11f   : > { %v2652_v56 = vpop.f32.mrf.mxu0  ;;  %v956_v47 = vadd.f32 %v2264_v55, %v801_v32  ;;  %v1109_v51 = vadd.f32 %v1086_v52, %v953_v42 }
 0x120   : > { %v940_v57 = vpop.f32.mrf.mxu1 }
 0x121   : > { %v2297_v59 = vpop.f32.mrf.mxu0 }
 0x122   : > { %v2283_v60 = vpop.f32.mrf.mxu1 }
 0x123   : > { %v1378_v62 = vpop.f32.mrf.mxu0  ;;  %v1262_v28 = vadd.f32 %v2283_v60, %v1106_v16  ;;  %v955_v60 = vadd.f32 %v940_v57, %v800_v44 }
 0x124   : > { %v1222_v63 = vpop.f32.mrf.mxu1 }
 0x125   : > { %v2300_v2 = vpop.f32.mrf.mxu0  ;;  %v1261_v21 = vadd.f32 %v1222_v63, %v1105_v27  ;;  %v1418_v23 = vadd.f32 %v2297_v59, %v1262_v28  ;;  %v1112_v59 = vadd.f32 %v2650_v54, %v956_v47  ;;  %v1111_v1 = vadd.f32 %v2652_v56, %v955_v60 }
 0x126   : > { %v2286_v3 = vpop.f32.mrf.mxu1 }
 0x127   : > { %v1388_v7 = vpop.f32.mrf.mxu0  ;;  %v1264_v39 = vadd.f32 %v2286_v3, %v1108_v33  ;;  %v1417_v58 = vadd.f32 %v1378_v62, %v1261_v21 }
 0x128   : > { %v1232_v8 = vpop.f32.mrf.mxu1 }
 0x129   : > { %v2303_v12 = vpop.f32.mrf.mxu0  ;;  %v1263_v25 = vadd.f32 %v1232_v8, %v1107_v45  ;;  %v1420_v48 = vadd.f32 %v2300_v2, %v1264_v39 }
 0x12a   : > { %v2289_v14 = vpop.f32.mrf.mxu1 }
 0x12b   : > { %v1398_v18 = vpop.f32.mrf.mxu0  ;;  %v1266_v53 = vadd.f32 %v2289_v14, %v1110_v36  ;;  %v1419_v62 = vadd.f32 %v1388_v7, %v1263_v25 }
 0x12c   : > { %v1242_v26 = vpop.f32.mrf.mxu1 }
 0x12d   : > { %v2306_v24 = vpop.f32.mrf.mxu0  ;;  %v1265_v52 = vadd.f32 %v1242_v26, %v1109_v51  ;;  %v1422_v2 = vadd.f32 %v2303_v12, %v1266_v53 }
 0x12e   : > { %v2292_v19 = vpop.f32.mrf.mxu1 }
 0x12f   : > { %v1408_v37 = vpop.f32.mrf.mxu0  ;;  %v1268_v4 = vadd.f32 %v2292_v19, %v1112_v59  ;;  %v1421_v8 = vadd.f32 %v1398_v18, %v1265_v52 }
 0x130   : > { %v1252_v43 = vpop.f32.mrf.mxu1 }
 0x131   : > { %v2325_v34 = vpop.f32.mrf.mxu0  ;;  %v1267_v9 = vadd.f32 %v1252_v43, %v1111_v1  ;;  %v1424_v14 = vadd.f32 %v2306_v24, %v1268_v4 }
 0x132   : > { %v2311_v49 = vpop.f32.mrf.mxu1 }
 0x133   : > { %v1574_v41 = vadd.f32 %v2311_v49, %v1418_v23  ;;  %v1690_v46 = vpop.f32.mrf.mxu0  ;;  %v1423_v20 = vadd.f32 %v1408_v37, %v1267_v9 }
 0x134   : > { %v1534_v38 = vpop.f32.mrf.mxu1 }
 0x135   : > { %v1730_v40 = vadd.f32 %v2325_v34, %v1574_v41  ;;  %v1573_v55 = vadd.f32 %v1534_v38, %v1417_v58  ;;  %v2328_v50 = vpop.f32.mrf.mxu0 }
 0x136   : > { %v2314_v61 = vpop.f32.mrf.mxu1 }
 0x137   : > { %1741 = vst.msk [vmem:[%s2660_s19 + $0x8] sm:$0xff] %vm1739_vm4, %v1730_v40  ;;  %v1729_v57 = vadd.f32 %v1690_v46, %v1573_v55  ;;  %v1576_v63 = vadd.f32 %v2314_v61, %v1420_v48  ;;  %v1700_v0 = vpop.f32.mrf.mxu0 }
 0x138   : > { %v1544_v3 = vpop.f32.mrf.mxu1 }
 0x139   : > { %1740 = vst.msk [vmem:[%s2660_s19] sm:$0xff] %vm1739_vm4, %v1729_v57  ;;  %v1732_v5 = vadd.f32 %v2328_v50, %v1576_v63  ;;  %v1575_v6 = vadd.f32 %v1544_v3, %v1419_v62  ;;  %v2331_v54 = vpop.f32.mrf.mxu0 }
 0x13a   : > { %v2317_v7 = vpop.f32.mrf.mxu1 }
 0x13b   : > { %1743 = vst.msk [vmem:[%s2660_s19 + $0x18] sm:$0xff] %vm1739_vm4, %v1732_v5  ;;  %v1731_v10 = vadd.f32 %v1700_v0, %v1575_v6  ;;  %v1578_v11 = vadd.f32 %v2317_v7, %v1422_v2  ;;  %v1710_v13 = vpop.f32.mrf.mxu0 }
 0x13c   : > { %v1554_v56 = vpop.f32.mrf.mxu1 }
 0x13d   : > { %1742 = vst.msk [vmem:[%s2660_s19 + $0x10] sm:$0xff] %vm1739_vm4, %v1731_v10  ;;  %v1734_v12 = vadd.f32 %v2331_v54, %v1578_v11  ;;  %v1577_v15 = vadd.f32 %v1554_v56, %v1421_v8  ;;  %v2334_v17 = vpop.f32.mrf.mxu0 }
 0x13e   : > { %v2320_v16 = vpop.f32.mrf.mxu1 }
 0x13f   : > { %1745 = vst.msk [vmem:[%s2660_s19 + $0x28] sm:$0xff] %vm1739_vm4, %v1734_v12  ;;  %v1733_v18 = vadd.f32 %v1710_v13, %v1577_v15  ;;  %v1580_v26 = vadd.f32 %v2320_v16, %v1424_v14  ;;  %v1720_v28 = vpop.f32.mrf.mxu0 }
 0x140   : > { %v1564_v22 = vpop.f32.mrf.mxu1 }
 0x141   : > { %1744 = vst.msk [vmem:[%s2660_s19 + $0x20] sm:$0xff] %vm1739_vm4, %v1733_v18  ;;  %v1736_v27 = vadd.f32 %v2334_v17, %v1580_v26  ;;  %v1579_v29 = vadd.f32 %v1564_v22, %v1423_v20  ;;  %1751 = sbr.rel (%p2122_p5) target bundleno = 460 (0x1cc), region = 44 }
 0x143   : > { %1747 = vst.msk [vmem:[%s2660_s19 + $0x38] sm:$0xff] %vm1739_vm4, %v1736_v27  ;;  %v1735_v24 = vadd.f32 %v1720_v28, %v1579_v29 }
 0x145   : > { %1746 = vst.msk [vmem:[%s2660_s19 + $0x30] sm:$0xff] %vm1739_vm4, %v1735_v24 }
 0x14c   : > { %v1752_v31 = vld [vmem:[%s2918_s4] sm:$0xff]  ;;  %v1753_v30 = vld [vmem:[%s2918_s4 + $0x8] sm:$0xff]  ;;  %v1754_v19 = vld [vmem:[%s2918_s4 + $0x10] sm:$0xff] }
 0x14d   : > { %v1755_v33 = vld [vmem:[%s2918_s4 + $0x18] sm:$0xff]  ;;  %v1768_v35 = vsel %vm1739_vm4, %v1752_v31, 0.0  ;;  %v1769_v21 = vsel %vm1739_vm4, %v1753_v30, 0.0  ;;  %v1771_v37 = vsel %vm1739_vm4, %v1754_v19, 0.0  ;;  %v1756_v32 = vld [vmem:[%s2918_s4 + $0x20] sm:$0xff]  ;;  %v1757_v45 = vld [vmem:[%s2918_s4 + $0x28] sm:$0xff] }
 0x14e   : > { %v1770_v42 = vadd.f32 %v1769_v21, %v1768_v35  ;;  %v1773_v43 = vsel %vm1739_vm4, %v1755_v33, 0.0  ;;  %v1775_v39 = vsel %vm1739_vm4, %v1756_v32, 0.0  ;;  %v1758_v34 = vld [vmem:[%s2918_s4 + $0x30] sm:$0xff]  ;;  %v1777_v47 = vsel %vm1739_vm4, %v1757_v45, 0.0  ;;  %v1759_v49 = vld [vmem:[%s2918_s4 + $0x38] sm:$0xff]  ;;  %v1760_v25 = vld [vmem:[%s2918_s4 + $0x40] sm:$0xff] }
 0x14f   : > { %v1779_v58 = vsel %vm1739_vm4, %v1758_v34, 0.0  ;;  %v1781_v46 = vsel %vm1739_vm4, %v1759_v49, 0.0  ;;  %v1761_v51 = vld [vmem:[%s2918_s4 + $0x48] sm:$0xff]  ;;  %v1783_v38 = vsel %vm1739_vm4, %v1760_v25, 0.0  ;;  %v1762_v48 = vld [vmem:[%s2918_s4 + $0x50] sm:$0xff]  ;;  %v1763_v55 = vld [vmem:[%s2918_s4 + $0x58] sm:$0xff] }
 0x150   : > { %v1772_v23 = vadd.f32 %v1771_v37, %v1770_v42  ;;  %v1785_v40 = vsel %vm1739_vm4, %v1761_v51, 0.0  ;;  %v1787_v59 = vsel %vm1739_vm4, %v1762_v48, 0.0  ;;  %v1764_v61 = vld [vmem:[%s2918_s4 + $0x60] sm:$0xff]  ;;  %v1789_v52 = vsel %vm1739_vm4, %v1763_v55, 0.0  ;;  %v1765_v57 = vld [vmem:[%s2918_s4 + $0x68] sm:$0xff]  ;;  %v1766_v1 = vld [vmem:[%s2918_s4 + $0x70] sm:$0xff] }
 0x151   : > { %v1791_v0 = vsel %vm1739_vm4, %v1764_v61, 0.0  ;;  %v1793_v2 = vsel %vm1739_vm4, %v1765_v57, 0.0  ;;  %v1767_v4 = vld [vmem:[%s2918_s4 + $0x78] sm:$0xff]  ;;  %v1795_v6 = vsel %vm1739_vm4, %v1766_v1, 0.0 }
 0x152   : > { %v1774_v44 = vadd.f32 %v1773_v43, %v1772_v23  ;;  %v1797_v7 = vsel %vm1739_vm4, %v1767_v4, 0.0 }
 0x154   : > { %v1776_v36 = vadd.f32 %v1775_v39, %v1774_v44 }
 0x156   : > { %v1778_v41 = vadd.f32 %v1777_v47, %v1776_v36 }
 0x158   : > { %v1780_v60 = vadd.f32 %v1779_v58, %v1778_v41 }
 0x15a   : > { %v1782_v53 = vadd.f32 %v1781_v46, %v1780_v60 }
 0x15c   : > { %v1784_v50 = vadd.f32 %v1783_v38, %v1782_v53 }
 0x15e   : > { %v1786_v62 = vadd.f32 %v1785_v40, %v1784_v50 }
 0x160   : > { %v1788_v63 = vadd.f32 %v1787_v59, %v1786_v62 }
 0x162   : > { %v1790_v3 = vadd.f32 %v1789_v52, %v1788_v63 }
 0x164   : > { %v1792_v5 = vadd.f32 %v1791_v0, %v1790_v3 }
 0x166   : > { %v1794_v54 = vadd.f32 %v1793_v2, %v1792_v5 }
 0x168   : > { %v1796_v8 = vadd.f32 %v1795_v6, %v1794_v54 }
 0x16a   : > { %v1798_v9 = vadd.f32 %v1797_v7, %v1796_v8 }
 0x16c   : > { %v1799_v10 = vrot.slane %v1798_v9, 4 }
 0x16e   : > { %v1800_v11 = vadd.f32 %v1799_v10, %v1798_v9 }
 0x170   : > { %v1801_v13 = vrot.slane %v1800_v11, 2 }
 0x172   : > { %v1802_v56 = vadd.f32 %v1801_v13, %v1800_v11 }
 0x174   : > { %v1803_v14 = vrot.slane %v1802_v56, 1 }
 0x176   : > { %v1804_v12 = vadd.f32 %v1803_v14, %v1802_v56 }
 0x178   : > { %v1806_v15 = vmul.f32 0.0078125, %v1804_v12 }
 0x17a   : > { %v2745_v16 = vsub.f32 %v1752_v31, %v1806_v15  ;;  %v2747_v17 = vsub.f32 %v1753_v30, %v1806_v15  ;;  %v2749_v20 = vsub.f32 %v1754_v19, %v1806_v15  ;;  %v2751_v18 = vsub.f32 %v1755_v33, %v1806_v15 }
 0x17b   : > { %v2753_v26 = vsub.f32 %v1756_v32, %v1806_v15  ;;  %v2761_v28 = vsub.f32 %v1757_v45, %v1806_v15  ;;  %v2765_v31 = vsub.f32 %v1758_v34, %v1806_v15  ;;  %v2772_v37 = vsub.f32 %v1759_v49, %v1806_v15 }
 0x17c   : > { %v1823_v22 = vmul.f32 %v2745_v16, %v2745_v16  ;;  %v1824_v27 = vmul.f32 %v2747_v17, %v2747_v17  ;;  %v1825_v29 = vmul.f32 %v2749_v20, %v2749_v20  ;;  %v1826_v24 = vmul.f32 %v2751_v18, %v2751_v18 }
 0x17d   : > { %v1827_v30 = vmul.f32 %v2753_v26, %v2753_v26  ;;  %v1828_v32 = vmul.f32 %v2761_v28, %v2761_v28  ;;  %v2777_v45 = vsub.f32 %v1760_v25, %v1806_v15  ;;  %v1829_v23 = vmul.f32 %v2765_v31, %v2765_v31 }
 0x17e   : > { %v1839_v19 = vsel %vm1739_vm4, %v1823_v22, 0.0  ;;  %v1840_v33 = vsel %vm1739_vm4, %v1824_v27, 0.0  ;;  %v1842_v35 = vsel %vm1739_vm4, %v1825_v29, 0.0  ;;  %v1844_v42 = vsel %vm1739_vm4, %v1826_v24, 0.0 }
 0x17f   : > { %v1841_v21 = vadd.f32 %v1840_v33, %v1839_v19  ;;  %v1846_v39 = vsel %vm1739_vm4, %v1827_v30, 0.0  ;;  %v2782_v44 = vsub.f32 %v1761_v51, %v1806_v15  ;;  %v1830_v47 = vmul.f32 %v2772_v37, %v2772_v37 }
 0x180   : > { %v1848_v49 = vsel %vm1739_vm4, %v1828_v32, 0.0  ;;  %v2787_v58 = vsub.f32 %v1762_v48, %v1806_v15  ;;  %v1831_v25 = vmul.f32 %v2777_v45, %v2777_v45  ;;  %v1850_v41 = vsel %vm1739_vm4, %v1829_v23, 0.0 }
 0x181   : > { %v1843_v43 = vadd.f32 %v1842_v35, %v1841_v21  ;;  %v2792_v60 = vsub.f32 %v1763_v55, %v1806_v15  ;;  %v1832_v51 = vmul.f32 %v2782_v44, %v2782_v44  ;;  %v1852_v38 = vsel %vm1739_vm4, %v1830_v47, 0.0  ;;  %v2123_v21 = vld [vmem:[%s2916_s2] ss:$0 sm:$0xff] }
 0x182   : > { %v2797_v40 = vsub.f32 %v1764_v61, %v1806_v15  ;;  %v1833_v48 = vmul.f32 %v2787_v58, %v2787_v58  ;;  %v1854_v50 = vsel %vm1739_vm4, %v1831_v25, 0.0  ;;  %v2802_v62 = vsub.f32 %v1765_v57, %v1806_v15 }
 0x183   : > { %v1845_v34 = vadd.f32 %v1844_v42, %v1843_v43  ;;  %v1834_v55 = vmul.f32 %v2792_v60, %v2792_v60  ;;  %v1856_v52 = vsel %vm1739_vm4, %v1832_v51, 0.0  ;;  %v2807_v0 = vsub.f32 %v1766_v1, %v1806_v15 }
 0x184   : > { %v1835_v61 = vmul.f32 %v2797_v40, %v2797_v40  ;;  %v1858_v3 = vsel %vm1739_vm4, %v1833_v48, 0.0  ;;  %v2812_v5 = vsub.f32 %v1767_v4, %v1806_v15  ;;  %v1836_v57 = vmul.f32 %v2802_v62, %v2802_v62 }
 0x185   : > { %v1847_v36 = vadd.f32 %v1846_v39, %v1845_v34  ;;  %v1860_v6 = vsel %vm1739_vm4, %v1834_v55, 0.0  ;;  %v1837_v7 = vmul.f32 %v2807_v0, %v2807_v0  ;;  %v2124_v39 = vld [vmem:[%s2917_s3] ss:$0 sm:$0xff] }
 0x186   : > { %v1862_v1 = vsel %vm1739_vm4, %v1835_v61, 0.0  ;;  %v1838_v9 = vmul.f32 %v2812_v5, %v2812_v5  ;;  %v1864_v10 = vsel %vm1739_vm4, %v1836_v57, 0.0 }
 0x187   : > { %v1849_v46 = vadd.f32 %v1848_v49, %v1847_v36  ;;  %v1866_v4 = vsel %vm1739_vm4, %v1837_v7, 0.0 }
 0x188   : > { %v1868_v56 = vsel %vm1739_vm4, %v1838_v9, 0.0 }
 0x189   : > { %v1851_v53 = vadd.f32 %v1850_v41, %v1849_v46 }
 0x18b   : > { %v1853_v59 = vadd.f32 %v1852_v38, %v1851_v53 }
 0x18d   : > { %v1855_v63 = vadd.f32 %v1854_v50, %v1853_v59 }
 0x18f   : > { %v1857_v2 = vadd.f32 %v1856_v52, %v1855_v63 }
 0x191   : > { %v1859_v54 = vadd.f32 %v1858_v3, %v1857_v2 }
 0x193   : > { %v1861_v8 = vadd.f32 %v1860_v6, %v1859_v54 }
 0x195   : > { %v1863_v11 = vadd.f32 %v1862_v1, %v1861_v8 }
 0x197   : > { %v1865_v13 = vadd.f32 %v1864_v10, %v1863_v11 }
 0x199   : > { %v1867_v14 = vadd.f32 %v1866_v4, %v1865_v13 }
 0x19b   : > { %v1869_v12 = vadd.f32 %v1868_v56, %v1867_v14 }
 0x19d   : > { %v1870_v15 = vrot.slane %v1869_v12, 4 }
 0x19f   : > { %v1871_v22 = vadd.f32 %v1870_v15, %v1869_v12 }
 0x1a1   : > { %v1872_v27 = vrot.slane %v1871_v22, 2 }
 0x1a3   : > { %v1873_v29 = vadd.f32 %v1872_v27, %v1871_v22 }
 0x1a5   : > { %v1874_v24 = vrot.slane %v1873_v29, 1 }
 0x1a7   : > { %v1875_v30 = vadd.f32 %v1874_v24, %v1873_v29 }
 0x1a9   : > { %v1876_v19 = vmul.f32 0.0078125, %v1875_v30 }
 0x1ab   : > { %v1877_v33 = vadd.f32 1e-05, %v1876_v19 }
 0x1ad   : > { %2346 = vrsqrt.f32 %v1877_v33 }
 0x1ba   : > { %v2347_v35 = vpop.eup %2346 }
 0x1bb   : > { %v1879_v32 = vmul.f32 %v2347_v35, %v2745_v16  ;;  %v1880_v42 = vmul.f32 %v2347_v35, %v2747_v17  ;;  %v1881_v43 = vmul.f32 %v2347_v35, %v2749_v20  ;;  %v1882_v23 = vmul.f32 %v2347_v35, %v2751_v18 }
 0x1bc   : > { %v1883_v34 = vmul.f32 %v2347_v35, %v2753_v26  ;;  %v1884_v47 = vmul.f32 %v2347_v35, %v2761_v28  ;;  %v1885_v49 = vmul.f32 %v2347_v35, %v2765_v31  ;;  %v1886_v36 = vmul.f32 %v2347_v35, %v2772_v37 }
 0x1bd   : > { %v1902_v25 = vmul.f32 %v2123_v21, %v1879_v32  ;;  %v1903_v16 = vmul.f32 %v2123_v21, %v1880_v42  ;;  %v1904_v41 = vmul.f32 %v2123_v21, %v1881_v43  ;;  %v1905_v17 = vmul.f32 %v2123_v21, %v1882_v23 }
 0x1be   : > { %v1906_v46 = vmul.f32 %v2123_v21, %v1883_v34  ;;  %v1907_v20 = vmul.f32 %v2123_v21, %v1884_v47  ;;  %v1908_v51 = vmul.f32 %v2123_v21, %v1885_v49  ;;  %v1909_v18 = vmul.f32 %v2123_v21, %v1886_v36 }
 0x1bf   : > { %v1925_v38 = vadd.f32 %v2124_v39, %v1902_v25  ;;  %v1926_v53 = vadd.f32 %v2124_v39, %v1903_v16  ;;  %v1927_v48 = vadd.f32 %v2124_v39, %v1904_v41  ;;  %v1928_v50 = vadd.f32 %v2124_v39, %v1905_v17 }
 0x1c0   : > { %v1929_v59 = vadd.f32 %v2124_v39, %v1906_v46  ;;  %v1930_v26 = vadd.f32 %v2124_v39, %v1907_v20  ;;  %v1931_v55 = vadd.f32 %v2124_v39, %v1908_v51  ;;  %v1932_v28 = vadd.f32 %v2124_v39, %v1909_v18 }
 0x1c1   : > { %1941 = vst.msk [vmem:[%s2918_s4] sm:$0xff] %vm1739_vm4, %v1925_v38  ;;  %1942 = vst.msk [vmem:[%s2918_s4 + $0x8] sm:$0xff] %vm1739_vm4, %v1926_v53  ;;  %v1887_v31 = vmul.f32 %v2347_v35, %v2777_v45  ;;  %v1888_v37 = vmul.f32 %v2347_v35, %v2782_v44  ;;  %v1889_v52 = vmul.f32 %v2347_v35, %v2787_v58 }
 0x1c2   : > { %1943 = vst.msk [vmem:[%s2918_s4 + $0x10] sm:$0xff] %vm1739_vm4, %v1927_v48  ;;  %1944 = vst.msk [vmem:[%s2918_s4 + $0x18] sm:$0xff] %vm1739_vm4, %v1928_v50  ;;  %v1890_v63 = vmul.f32 %v2347_v35, %v2792_v60  ;;  %v1891_v45 = vmul.f32 %v2347_v35, %v2797_v40  ;;  %v1892_v44 = vmul.f32 %v2347_v35, %v2802_v62 }
 0x1c3   : > { %1945 = vst.msk [vmem:[%s2918_s4 + $0x20] sm:$0xff] %vm1739_vm4, %v1929_v59  ;;  %1946 = vst.msk [vmem:[%s2918_s4 + $0x28] sm:$0xff] %vm1739_vm4, %v1930_v26  ;;  %v1893_v58 = vmul.f32 %v2347_v35, %v2807_v0  ;;  %v1894_v60 = vmul.f32 %v2347_v35, %v2812_v5  ;;  %v1910_v61 = vmul.f32 %v2123_v21, %v1887_v31 }
 0x1c4   : > { %1947 = vst.msk [vmem:[%s2918_s4 + $0x30] sm:$0xff] %vm1739_vm4, %v1931_v55  ;;  %1948 = vst.msk [vmem:[%s2918_s4 + $0x38] sm:$0xff] %vm1739_vm4, %v1932_v28  ;;  %v1911_v3 = vmul.f32 %v2123_v21, %v1888_v37  ;;  %v1912_v2 = vmul.f32 %v2123_v21, %v1889_v52  ;;  %v1913_v57 = vmul.f32 %v2123_v21, %v1890_v63 }
 0x1c5   : > { %v1914_v6 = vmul.f32 %v2123_v21, %v1891_v45  ;;  %v1915_v54 = vmul.f32 %v2123_v21, %v1892_v44  ;;  %v1916_v7 = vmul.f32 %v2123_v21, %v1893_v58  ;;  %v1917_v1 = vmul.f32 %v2123_v21, %v1894_v60 }
 0x1c6   : > { %v1933_v8 = vadd.f32 %v2124_v39, %v1910_v61  ;;  %v1934_v9 = vadd.f32 %v2124_v39, %v1911_v3  ;;  %v1935_v10 = vadd.f32 %v2124_v39, %v1912_v2  ;;  %v1936_v11 = vadd.f32 %v2124_v39, %v1913_v57 }
 0x1c7   : > { %v1937_v4 = vadd.f32 %v2124_v39, %v1914_v6  ;;  %v1938_v40 = vadd.f32 %v2124_v39, %v1915_v54  ;;  %v1939_v13 = vadd.f32 %v2124_v39, %v1916_v7  ;;  %v1940_v62 = vadd.f32 %v2124_v39, %v1917_v1 }
 0x1c8   : > { %1949 = vst.msk [vmem:[%s2918_s4 + $0x40] sm:$0xff] %vm1739_vm4, %v1933_v8  ;;  %1950 = vst.msk [vmem:[%s2918_s4 + $0x48] sm:$0xff] %vm1739_vm4, %v1934_v9 }
 0x1c9   : > { %1951 = vst.msk [vmem:[%s2918_s4 + $0x50] sm:$0xff] %vm1739_vm4, %v1935_v10  ;;  %1952 = vst.msk [vmem:[%s2918_s4 + $0x58] sm:$0xff] %vm1739_vm4, %v1936_v11 }
 0x1ca   : > { %1953 = vst.msk [vmem:[%s2918_s4 + $0x60] sm:$0xff] %vm1739_vm4, %v1937_v4  ;;  %1954 = vst.msk [vmem:[%s2918_s4 + $0x68] sm:$0xff] %vm1739_vm4, %v1938_v40 }
 0x1cb   : > { %1955 = vst.msk [vmem:[%s2918_s4 + $0x70] sm:$0xff] %vm1739_vm4, %v1939_v13  ;;  %1956 = vst.msk [vmem:[%s2918_s4 + $0x78] sm:$0xff] %vm1739_vm4, %v1940_v62 }
 0x1cc PF: > { %s14_s15 = sadd.s32 1, %s2354_s15  }
 0x1cd   : > { %p11_p6 = scmp.ge.s32.totalorder %s14_s15, 4  }
 0x1cf   :  { %13 = sbr.rel (!%p11_p6) target bundleno = 1 (0x1), region = 142 }

</bundles_post_ra>
